<compile_context>
chip_gen: v6e
topology: v6e:2x2x1
jax: 0.10.0
libtpu: 0.0.40
codegen_flags: <defaults>
</compile_context>

<pallas_src>
import functools

import jax
import jax.numpy as jnp
from jax.experimental import pallas as pl
from jax.experimental.pallas import tpu as pltpu


# ----------------------------------------------------------------------------- kernel
def _deepset_kernel(x_ref, mask_ref,
                    w1e_ref, w2e_ref, w1d_ref, w2d_ref, b_ref,
                    out_ref):
    TB, L = mask_ref.shape
    Dp = x_ref.shape[-1]
    b = b_ref[...]                                                     # f32 (8, Dp)

    # ---- encoder MLP: two lane-dense (TB*L, Dp) @ (Dp, Dp) MXU matmuls (bf16 in, f32 acc)
    h = jnp.dot(x_ref[...], w1e_ref[...], preferred_element_type=jnp.float32)
    h = jnp.maximum(h + b[0:1, :], 0.0)                                # f32 VPU
    h = jnp.dot(h.astype(jnp.bfloat16), w2e_ref[...],
                preferred_element_type=jnp.float32)
    h = jnp.maximum(h + b[1:2, :], 0.0)                                # f32 (TB*L, Dp)

    # ---- masked mean pooling: VPU multiply + sum over L (no pooling matmul) ----
    # mask is exact 0/1 in f32; the 1/L factor is applied afterwards in f32.
    hm = h.reshape(TB, L, Dp) * mask_ref[...][:, :, None]              # f32 (TB, L, Dp)
    m = jnp.sum(hm, axis=1) * jnp.float32(1.0 / L)                     # f32 (TB, Dp)

    # ---- decoder MLP on the pooled representation ----
    g = jnp.dot(m.astype(jnp.bfloat16), w1d_ref[...],
                preferred_element_type=jnp.float32)
    g = jnp.maximum(g + b[2:3, :], 0.0)
    g = jnp.dot(g.astype(jnp.bfloat16), w2d_ref[...],
                preferred_element_type=jnp.float32)
    g = jnp.maximum(g + b[3:4, :], 0.0)

    out_ref[...] = g.astype(out_ref.dtype)


# ----------------------------------------------------------------------- sizing helpers
def _round_up(n, m):
    return -(-n // m) * m


def _vmem_capacity_bytes():
    """Physical VMEM of the attached TPU (128 MiB v5e/v6e, 64 MiB v7x)."""
    try:
        info = pltpu.get_tpu_info()
        for name in ("vmem_capacity_bytes", "vmem_size_bytes", "vmem_bytes"):
            cap = getattr(info, name, None)
            if cap:
                return int(cap)
    except Exception:
        pass
    return 128 * 1024 * 1024


def _pick_tile_b(batch, length, vmem_cap):
    """Batch tile (multiple of 8). ~1024 flattened rows on 64 MiB-VMEM chips (v7x),
    ~2048 on 128 MiB chips (v5e/v6e); keep >= 2 grid steps so both v7x TCs get work."""
    rows_target = 1024 if vmem_cap <= 64 * 1024 * 1024 else 2048
    tb = max(8, _round_up(max(1, rows_target // max(length, 1)), 8))
    tb = min(tb, _round_up(batch, 8))
    if batch > 8 and tb >= batch:
        tb = max(8, _round_up(-(-batch // 2), 8))      # force a >=2-step grid
    return tb


def _vmem_limit(tb, length, dp, single_buffer_weights, vmem_cap):
    """Explicit scoped-VMEM budget computed from the actual block footprint."""
    x_bytes = tb * length * dp * 2 * 2                  # bf16 x block, double-buffered
    m_bytes = tb * length * 4 * 2                       # f32 mask block
    wbuf = 1 if single_buffer_weights else 2
    w_bytes = (4 * dp * dp * 2 + 8 * dp * 4) * wbuf     # bf16 weights + f32 biases
    o_bytes = tb * dp * 4 * 2                           # f32 out block
    interm = 3 * tb * length * dp * 4                   # f32 h/hm intermediates headroom
    need = int((x_bytes + m_bytes + w_bytes + o_bytes + interm) * 1.5)
    return max(32 * 1024 * 1024, min(need, vmem_cap * 3 // 4))


# --------------------------------------------------------------------------- host prep
def pad_params(params, dim):
    """One-time pad/cast: (D, D) weights -> (Dp, Dp) bf16, biases stacked into (8, Dp) f32.

    Weights are stored as (D_in, D_out) (transposed vs. PyTorch's (out, in)).
    Zero-padded rows/cols keep padded feature lanes exactly zero through the MLPs.
    """
    dp = _round_up(max(dim, 1), 128)

    def w(name):
        return jnp.pad(params[name].astype(jnp.bfloat16),
                       ((0, dp - dim), (0, dp - dim)))

    biases = jnp.zeros((8, dp), jnp.float32)
    for i, name in enumerate(("b1e", "b2e", "b1d", "b2d")):
        biases = biases.at[i, :dim].set(params[name].reshape(-1).astype(jnp.float32))

    return {"w1e": w("w1e"), "w2e": w("w2e"),
            "w1d": w("w1d"), "w2d": w("w2d"),
            "biases": biases}


@functools.partial(jax.jit,
                   static_argnames=("tile_b", "vmem_cap", "single_buffer_weights"))
def _deepset_impl(x, mask, p, *, tile_b, vmem_cap, single_buffer_weights):
    B, L, D = x.shape
    Dp = p["w1e"].shape[0]
    TB = tile_b
    Bp = _round_up(max(B, TB), TB)

    f32, bf16 = jnp.float32, jnp.bfloat16

    # Cast x to bf16 *before* padding (halves the padded intermediate), flatten to 2-D
    # so every grid step DMAs one plain lane-dense (TB*L, Dp) tile.
    x_flat = jnp.pad(x.astype(bf16),
                     ((0, Bp - B), (0, 0), (0, Dp - D))).reshape(Bp * L, Dp)
    mask_p = jnp.pad(mask.astype(f32), ((0, Bp - B), (0, 0)))          # exact 0/1 in f32

    const_kwargs = {"pipeline_mode": pl.Buffered(1)} if single_buffer_weights else {}
    wspec = pl.BlockSpec((Dp, Dp), lambda i: (0, 0), **const_kwargs)   # resident weights
    bspec = pl.BlockSpec((8, Dp), lambda i: (0, 0), **const_kwargs)    # stacked biases

    in_specs = [
        pl.BlockSpec((TB * L, Dp), lambda i: (i, 0)),                  # x tile
        pl.BlockSpec((TB, L), lambda i: (i, 0)),                       # mask tile
        wspec, wspec, wspec, wspec, bspec,
    ]

    out = pl.pallas_call(
        _deepset_kernel,
        grid=(Bp // TB,),
        out_shape=jax.ShapeDtypeStruct((Bp, Dp), f32),
        in_specs=in_specs,
        out_specs=pl.BlockSpec((TB, Dp), lambda i: (i, 0)),
        compiler_params=pltpu.CompilerParams(
            dimension_semantics=("parallel",),          # batch tiles are independent
            vmem_limit_bytes=_vmem_limit(TB, L, Dp, single_buffer_weights, vmem_cap),
        ),
    )(x_flat, mask_p, p["w1e"], p["w2e"], p["w1d"], p["w2d"], p["biases"])

    return out[:B, :D]


def deepset_layer(x, mask, padded_params, *, tile_b=None):
    """x: (B, L, D) float, mask: (B, L) float, padded_params: output of pad_params()."""
    B, L, _ = x.shape
    vmem_cap = _vmem_capacity_bytes()
    TB = tile_b if tile_b is not None else _pick_tile_b(B, L, vmem_cap)
    try:
        return _deepset_impl(x, mask, padded_params, tile_b=TB,
                             vmem_cap=vmem_cap, single_buffer_weights=True)
    except Exception:
        # Fallback if this JAX build rejects pipeline_mode=pl.Buffered(1).
        return _deepset_impl(x, mask, padded_params, tile_b=TB,
                             vmem_cap=vmem_cap, single_buffer_weights=False)


# ----------------------------------------------------------------------------- testing
def init_params(key, dim):
    """Deterministic init roughly matching nn.Linear's uniform(-1/sqrt(dim), 1/sqrt(dim))."""
    bound = 1.0 / (dim ** 0.5)
    keys = jax.random.split(key, 8)

    def u(k, shape):
        return jax.random.uniform(k, shape, jnp.float32, -bound, bound)

    return {
        "w1e": u(keys[0], (dim, dim)), "b1e": u(keys[1], (1, dim)),
        "w2e": u(keys[2], (dim, dim)), "b2e": u(keys[3], (1, dim)),
        "w1d": u(keys[4], (dim, dim)), "b1d": u(keys[5], (1, dim)),
        "w2d": u(keys[6], (dim, dim)), "b2d": u(keys[7], (1, dim)),
    }


def deepset_reference(x, mask, p):
    """Pure-JAX f32 reference mirroring the PyTorch forward."""
    B, L, D = x.shape
    h = jnp.maximum(x.reshape(-1, D) @ p["w1e"] + p["b1e"], 0.0)
    h = jnp.maximum(h @ p["w2e"] + p["b2e"], 0.0)
    h = h.reshape(B, L, D) * mask[..., None]
    m = h.mean(axis=-2)
    g = jnp.maximum(m @ p["w1d"] + p["b1d"], 0.0)
    g = jnp.maximum(g @ p["w2d"] + p["b2d"], 0.0)
    return g


if __name__ == "__main__":
    B, L, D = 16, 8, 32
    key = jax.random.PRNGKey(0)
    kx, kmask, kp = jax.random.split(key, 3)

    x = jax.random.normal(kx, (B, L, D), jnp.float32)
    mask = (jax.random.uniform(kmask, (B, L)) > 0.3).astype(jnp.float32)
    params = init_params(kp, D)
    padded = pad_params(params, D)      # one-time weight pad/cast (outside steady state)

    # tile_b=8 -> a 2-step batch grid, exercising the pipelined multi-tile path.
    out = deepset_layer(x, mask, padded, tile_b=8)
    out = jax.block_until_ready(out)

    ref = deepset_reference(x, mask, params)
    assert out.shape == (B, D)
    # bf16 MXU inputs (f32 accumulation) vs pure-f32 reference -> loosened tolerance.
    assert jnp.allclose(out, ref, atol=3e-2, rtol=3e-2), "mismatch vs JAX reference"
    print("KERNEL_OK")
</pallas_src>

<mosaic_0001>
module attributes {stable_mosaic.version = 11 : i64} {
  func.func @_deepset_kernel(%arg0: i32, %arg1: memref<64x128xbf16, #tpu.memory_space<vmem>>, %arg2: memref<8x8xf32, #tpu.memory_space<vmem>>, %arg3: memref<128x128xbf16, #tpu.memory_space<vmem>>, %arg4: memref<128x128xbf16, #tpu.memory_space<vmem>>, %arg5: memref<128x128xbf16, #tpu.memory_space<vmem>>, %arg6: memref<128x128xbf16, #tpu.memory_space<vmem>>, %arg7: memref<8x128xf32, #tpu.memory_space<vmem>>, %arg8: memref<8x128xf32, #tpu.memory_space<vmem>>) attributes {dimension_semantics = [#tpu.dimension_semantics<parallel>], iteration_bounds = array<i64: 2>, scalar_prefetch = 0 : i64, scratch_operands = 0 : i64, tpu.core_type = #tpu.core_type<tc>, window_params = [{transform_indices = @transform_0, window_bounds = array<i64: 64, 128>}, {transform_indices = @transform_1, window_bounds = array<i64: 8, 8>}, {pipeline_mode = #tpu.pipeline_mode<synchronous>, transform_indices = @transform_2, window_bounds = array<i64: 128, 128>}, {pipeline_mode = #tpu.pipeline_mode<synchronous>, transform_indices = @transform_3, window_bounds = array<i64: 128, 128>}, {pipeline_mode = #tpu.pipeline_mode<synchronous>, transform_indices = @transform_4, window_bounds = array<i64: 128, 128>}, {pipeline_mode = #tpu.pipeline_mode<synchronous>, transform_indices = @transform_5, window_bounds = array<i64: 128, 128>}, {pipeline_mode = #tpu.pipeline_mode<synchronous>, transform_indices = @transform_6, window_bounds = array<i64: 8, 128>}, {transform_indices = @transform_7, window_bounds = array<i64: 8, 128>}]} {
    %c0 = arith.constant 0 : index
    %c0_0 = arith.constant 0 : index
    %0 = vector.load %arg7[%c0, %c0_0] : memref<8x128xf32, #tpu.memory_space<vmem>>, vector<8x128xf32>
    %c0_1 = arith.constant 0 : index
    %c0_2 = arith.constant 0 : index
    %1 = vector.load %arg1[%c0_1, %c0_2] : memref<64x128xbf16, #tpu.memory_space<vmem>>, vector<64x128xbf16>
    %c0_3 = arith.constant 0 : index
    %c0_4 = arith.constant 0 : index
    %2 = vector.load %arg3[%c0_3, %c0_4] : memref<128x128xbf16, #tpu.memory_space<vmem>>, vector<128x128xbf16>
    %cst = arith.constant dense<0.000000e+00> : vector<64x128xf32>
    %3 = tpu.matmul %1, %2, %cst {dimension_numbers = #tpu.dot_dimension_numbers<[1], [0], [0], [1], [0, 0, 1, 1], [], []>} : vector<64x128xbf16>, vector<128x128xbf16>, vector<64x128xf32> -> vector<64x128xf32>
    %4 = vector.extract_strided_slice %0 {offsets = [0, 0], sizes = [1, 128], strides = [1, 1]} : vector<8x128xf32> to vector<1x128xf32>
    %5 = vector.broadcast %4 : vector<1x128xf32> to vector<64x128xf32>
    %6 = arith.addf %3, %5 : vector<64x128xf32>
    %cst_5 = arith.constant 0.000000e+00 : f32
    %7 = vector.broadcast %cst_5 : f32 to vector<64x128xf32>
    %8 = arith.maximumf %6, %7 : vector<64x128xf32>
    %9 = arith.truncf %8 : vector<64x128xf32> to vector<64x128xbf16>
    %c0_6 = arith.constant 0 : index
    %c0_7 = arith.constant 0 : index
    %10 = vector.load %arg4[%c0_6, %c0_7] : memref<128x128xbf16, #tpu.memory_space<vmem>>, vector<128x128xbf16>
    %cst_8 = arith.constant dense<0.000000e+00> : vector<64x128xf32>
    %11 = tpu.matmul %9, %10, %cst_8 {dimension_numbers = #tpu.dot_dimension_numbers<[1], [0], [0], [1], [0, 0, 1, 1], [], []>} : vector<64x128xbf16>, vector<128x128xbf16>, vector<64x128xf32> -> vector<64x128xf32>
    %12 = vector.extract_strided_slice %0 {offsets = [1, 0], sizes = [1, 128], strides = [1, 1]} : vector<8x128xf32> to vector<1x128xf32>
    %13 = vector.broadcast %12 : vector<1x128xf32> to vector<64x128xf32>
    %14 = arith.addf %11, %13 : vector<64x128xf32>
    %cst_9 = arith.constant 0.000000e+00 : f32
    %15 = vector.broadcast %cst_9 : f32 to vector<64x128xf32>
    %16 = arith.maximumf %14, %15 : vector<64x128xf32>
    %17 = vector.shape_cast %16 : vector<64x128xf32> to vector<8x8x128xf32>
    %c0_10 = arith.constant 0 : index
    %c0_11 = arith.constant 0 : index
    %18 = vector.load %arg2[%c0_10, %c0_11] : memref<8x8xf32, #tpu.memory_space<vmem>>, vector<8x8xf32>
    %19 = vector.shape_cast %18 : vector<8x8xf32> to vector<8x8x1xf32>
    %20 = vector.broadcast %19 : vector<8x8x1xf32> to vector<8x8x128xf32>
    %21 = arith.mulf %17, %20 : vector<8x8x128xf32>
    %cst_12 = arith.constant dense<0.000000e+00> : vector<8x128xf32>
    %22 = vector.multi_reduction <add>, %21, %cst_12 [1] : vector<8x8x128xf32> to vector<8x128xf32>
    %cst_13 = arith.constant 1.250000e-01 : f32
    %23 = vector.broadcast %cst_13 : f32 to vector<8x128xf32>
    %24 = arith.mulf %22, %23 : vector<8x128xf32>
    %25 = arith.truncf %24 : vector<8x128xf32> to vector<8x128xbf16>
    %c0_14 = arith.constant 0 : index
    %c0_15 = arith.constant 0 : index
    %26 = vector.load %arg5[%c0_14, %c0_15] : memref<128x128xbf16, #tpu.memory_space<vmem>>, vector<128x128xbf16>
    %cst_16 = arith.constant dense<0.000000e+00> : vector<8x128xf32>
    %27 = tpu.matmul %25, %26, %cst_16 {dimension_numbers = #tpu.dot_dimension_numbers<[1], [0], [0], [1], [0, 0, 1, 1], [], []>} : vector<8x128xbf16>, vector<128x128xbf16>, vector<8x128xf32> -> vector<8x128xf32>
    %28 = vector.extract_strided_slice %0 {offsets = [2, 0], sizes = [1, 128], strides = [1, 1]} : vector<8x128xf32> to vector<1x128xf32>
    %29 = vector.broadcast %28 : vector<1x128xf32> to vector<8x128xf32>
    %30 = arith.addf %27, %29 : vector<8x128xf32>
    %cst_17 = arith.constant 0.000000e+00 : f32
    %31 = vector.broadcast %cst_17 : f32 to vector<8x128xf32>
    %32 = arith.maximumf %30, %31 : vector<8x128xf32>
    %33 = arith.truncf %32 : vector<8x128xf32> to vector<8x128xbf16>
    %c0_18 = arith.constant 0 : index
    %c0_19 = arith.constant 0 : index
    %34 = vector.load %arg6[%c0_18, %c0_19] : memref<128x128xbf16, #tpu.memory_space<vmem>>, vector<128x128xbf16>
    %cst_20 = arith.constant dense<0.000000e+00> : vector<8x128xf32>
    %35 = tpu.matmul %33, %34, %cst_20 {dimension_numbers = #tpu.dot_dimension_numbers<[1], [0], [0], [1], [0, 0, 1, 1], [], []>} : vector<8x128xbf16>, vector<128x128xbf16>, vector<8x128xf32> -> vector<8x128xf32>
    %36 = vector.extract_strided_slice %0 {offsets = [3, 0], sizes = [1, 128], strides = [1, 1]} : vector<8x128xf32> to vector<1x128xf32>
    %37 = vector.broadcast %36 : vector<1x128xf32> to vector<8x128xf32>
    %38 = arith.addf %35, %37 : vector<8x128xf32>
    %cst_21 = arith.constant 0.000000e+00 : f32
    %39 = vector.broadcast %cst_21 : f32 to vector<8x128xf32>
    %40 = arith.maximumf %38, %39 : vector<8x128xf32>
    %c0_22 = arith.constant 0 : index
    %c0_23 = arith.constant 0 : index
    %41 = vector.load %arg8[%c0_22, %c0_23] : memref<8x128xf32, #tpu.memory_space<vmem>>, vector<8x128xf32>
    tpu.vector_store %arg8[%c0_22, %c0_23], %40 {strides = array<i32>} : memref<8x128xf32, #tpu.memory_space<vmem>>, vector<8x128xf32>,
    return
  }
  func.func @transform_0(%arg0: i32) -> (i32, i32) {
    %c0_i32 = arith.constant 0 : i32
    %c0_i32_0 = arith.constant 0 : i32
    return %arg0, %c0_i32 : i32, i32
  }
  func.func @transform_1(%arg0: i32) -> (i32, i32) {
    %c0_i32 = arith.constant 0 : i32
    %c0_i32_0 = arith.constant 0 : i32
    return %arg0, %c0_i32 : i32, i32
  }
  func.func @transform_2(%arg0: i32) -> (i32, i32) {
    %c0_i32 = arith.constant 0 : i32
    %c0_i32_0 = arith.constant 0 : i32
    %c0_i32_1 = arith.constant 0 : i32
    return %c0_i32, %c0_i32_0 : i32, i32
  }
  func.func @transform_3(%arg0: i32) -> (i32, i32) {
    %c0_i32 = arith.constant 0 : i32
    %c0_i32_0 = arith.constant 0 : i32
    %c0_i32_1 = arith.constant 0 : i32
    return %c0_i32, %c0_i32_0 : i32, i32
  }
  func.func @transform_4(%arg0: i32) -> (i32, i32) {
    %c0_i32 = arith.constant 0 : i32
    %c0_i32_0 = arith.constant 0 : i32
    %c0_i32_1 = arith.constant 0 : i32
    return %c0_i32, %c0_i32_0 : i32, i32
  }
  func.func @transform_5(%arg0: i32) -> (i32, i32) {
    %c0_i32 = arith.constant 0 : i32
    %c0_i32_0 = arith.constant 0 : i32
    %c0_i32_1 = arith.constant 0 : i32
    return %c0_i32, %c0_i32_0 : i32, i32
  }
  func.func @transform_6(%arg0: i32) -> (i32, i32) {
    %c0_i32 = arith.constant 0 : i32
    %c0_i32_0 = arith.constant 0 : i32
    %c0_i32_1 = arith.constant 0 : i32
    return %c0_i32, %c0_i32_0 : i32, i32
  }
  func.func @transform_7(%arg0: i32) -> (i32, i32) {
    %c0_i32 = arith.constant 0 : i32
    %c0_i32_0 = arith.constant 0 : i32
    return %arg0, %c0_i32 : i32, i32
  }
}

module attributes {stable_mosaic.version = 11 : i64} {
  func.func @_deepset_kernel(%arg0: i32, %arg1: memref<64x128xbf16, #tpu.memory_space<vmem>>, %arg2: memref<8x8xf32, #tpu.memory_space<vmem>>, %arg3: memref<128x128xbf16, #tpu.memory_space<vmem>>, %arg4: memref<128x128xbf16, #tpu.memory_space<vmem>>, %arg5: memref<128x128xbf16, #tpu.memory_space<vmem>>, %arg6: memref<128x128xbf16, #tpu.memory_space<vmem>>, %arg7: memref<8x128xf32, #tpu.memory_space<vmem>>, %arg8: memref<8x128xf32, #tpu.memory_space<vmem>>) attributes {dimension_semantics = [#tpu.dimension_semantics<parallel>], iteration_bounds = array<i64: 2>, scalar_prefetch = 0 : i64, scratch_operands = 0 : i64, tpu.core_type = #tpu.core_type<tc>, window_params = [{transform_indices = @transform_0, window_bounds = array<i64: 64, 128>}, {transform_indices = @transform_1, window_bounds = array<i64: 8, 8>}, {pipeline_mode = #tpu.pipeline_mode<synchronous>, transform_indices = @transform_2, window_bounds = array<i64: 128, 128>}, {pipeline_mode = #tpu.pipeline_mode<synchronous>, transform_indices = @transform_3, window_bounds = array<i64: 128, 128>}, {pipeline_mode = #tpu.pipeline_mode<synchronous>, transform_indices = @transform_4, window_bounds = array<i64: 128, 128>}, {pipeline_mode = #tpu.pipeline_mode<synchronous>, transform_indices = @transform_5, window_bounds = array<i64: 128, 128>}, {pipeline_mode = #tpu.pipeline_mode<synchronous>, transform_indices = @transform_6, window_bounds = array<i64: 8, 128>}, {transform_indices = @transform_7, window_bounds = array<i64: 8, 128>}]} {
    %c0 = arith.constant 0 : index
    %c0_0 = arith.constant 0 : index
    %0 = vector.load %arg7[%c0, %c0_0] : memref<8x128xf32, #tpu.memory_space<vmem>>, vector<8x128xf32>
    %c0_1 = arith.constant 0 : index
    %c0_2 = arith.constant 0 : index
    %1 = vector.load %arg1[%c0_1, %c0_2] : memref<64x128xbf16, #tpu.memory_space<vmem>>, vector<64x128xbf16>
    %c0_3 = arith.constant 0 : index
    %c0_4 = arith.constant 0 : index
    %2 = vector.load %arg3[%c0_3, %c0_4] : memref<128x128xbf16, #tpu.memory_space<vmem>>, vector<128x128xbf16>
    %cst = arith.constant dense<0.000000e+00> : vector<64x128xf32>
    %3 = tpu.matmul %1, %2, %cst {dimension_numbers = #tpu.dot_dimension_numbers<[1], [0], [0], [1], [0, 0, 1, 1], [], []>} : vector<64x128xbf16>, vector<128x128xbf16>, vector<64x128xf32> -> vector<64x128xf32>
    %4 = vector.extract_strided_slice %0 {offsets = [0, 0], sizes = [1, 128], strides = [1, 1]} : vector<8x128xf32> to vector<1x128xf32>
    %5 = vector.broadcast %4 : vector<1x128xf32> to vector<64x128xf32>
    %6 = arith.addf %3, %5 : vector<64x128xf32>
    %cst_5 = arith.constant 0.000000e+00 : f32
    %7 = vector.broadcast %cst_5 : f32 to vector<64x128xf32>
    %8 = arith.maximumf %6, %7 : vector<64x128xf32>
    %9 = arith.truncf %8 : vector<64x128xf32> to vector<64x128xbf16>
    %c0_6 = arith.constant 0 : index
    %c0_7 = arith.constant 0 : index
    %10 = vector.load %arg4[%c0_6, %c0_7] : memref<128x128xbf16, #tpu.memory_space<vmem>>, vector<128x128xbf16>
    %cst_8 = arith.constant dense<0.000000e+00> : vector<64x128xf32>
    %11 = tpu.matmul %9, %10, %cst_8 {dimension_numbers = #tpu.dot_dimension_numbers<[1], [0], [0], [1], [0, 0, 1, 1], [], []>} : vector<64x128xbf16>, vector<128x128xbf16>, vector<64x128xf32> -> vector<64x128xf32>
    %12 = vector.extract_strided_slice %0 {offsets = [1, 0], sizes = [1, 128], strides = [1, 1]} : vector<8x128xf32> to vector<1x128xf32>
    %13 = vector.broadcast %12 : vector<1x128xf32> to vector<64x128xf32>
    %14 = arith.addf %11, %13 : vector<64x128xf32>
    %cst_9 = arith.constant 0.000000e+00 : f32
    %15 = vector.broadcast %cst_9 : f32 to vector<64x128xf32>
    %16 = arith.maximumf %14, %15 : vector<64x128xf32>
    %17 = vector.shape_cast %16 : vector<64x128xf32> to vector<8x8x128xf32>
    %c0_10 = arith.constant 0 : index
    %c0_11 = arith.constant 0 : index
    %18 = vector.load %arg2[%c0_10, %c0_11] : memref<8x8xf32, #tpu.memory_space<vmem>>, vector<8x8xf32>
    %19 = vector.shape_cast %18 : vector<8x8xf32> to vector<8x8x1xf32>
    %20 = vector.broadcast %19 : vector<8x8x1xf32> to vector<8x8x128xf32>
    %21 = arith.mulf %17, %20 : vector<8x8x128xf32>
    %cst_12 = arith.constant dense<0.000000e+00> : vector<8x128xf32>
    %22 = vector.multi_reduction <add>, %21, %cst_12 [1] : vector<8x8x128xf32> to vector<8x128xf32>
    %cst_13 = arith.constant 1.250000e-01 : f32
    %23 = vector.broadcast %cst_13 : f32 to vector<8x128xf32>
    %24 = arith.mulf %22, %23 : vector<8x128xf32>
    %25 = arith.truncf %24 : vector<8x128xf32> to vector<8x128xbf16>
    %c0_14 = arith.constant 0 : index
    %c0_15 = arith.constant 0 : index
    %26 = vector.load %arg5[%c0_14, %c0_15] : memref<128x128xbf16, #tpu.memory_space<vmem>>, vector<128x128xbf16>
    %cst_16 = arith.constant dense<0.000000e+00> : vector<8x128xf32>
    %27 = tpu.matmul %25, %26, %cst_16 {dimension_numbers = #tpu.dot_dimension_numbers<[1], [0], [0], [1], [0, 0, 1, 1], [], []>} : vector<8x128xbf16>, vector<128x128xbf16>, vector<8x128xf32> -> vector<8x128xf32>
    %28 = vector.extract_strided_slice %0 {offsets = [2, 0], sizes = [1, 128], strides = [1, 1]} : vector<8x128xf32> to vector<1x128xf32>
    %29 = vector.broadcast %28 : vector<1x128xf32> to vector<8x128xf32>
    %30 = arith.addf %27, %29 : vector<8x128xf32>
    %cst_17 = arith.constant 0.000000e+00 : f32
    %31 = vector.broadcast %cst_17 : f32 to vector<8x128xf32>
    %32 = arith.maximumf %30, %31 : vector<8x128xf32>
    %33 = arith.truncf %32 : vector<8x128xf32> to vector<8x128xbf16>
    %c0_18 = arith.constant 0 : index
    %c0_19 = arith.constant 0 : index
    %34 = vector.load %arg6[%c0_18, %c0_19] : memref<128x128xbf16, #tpu.memory_space<vmem>>, vector<128x128xbf16>
    %cst_20 = arith.constant dense<0.000000e+00> : vector<8x128xf32>
    %35 = tpu.matmul %33, %34, %cst_20 {dimension_numbers = #tpu.dot_dimension_numbers<[1], [0], [0], [1], [0, 0, 1, 1], [], []>} : vector<8x128xbf16>, vector<128x128xbf16>, vector<8x128xf32> -> vector<8x128xf32>
    %36 = vector.extract_strided_slice %0 {offsets = [3, 0], sizes = [1, 128], strides = [1, 1]} : vector<8x128xf32> to vector<1x128xf32>
    %37 = vector.broadcast %36 : vector<1x128xf32> to vector<8x128xf32>
    %38 = arith.addf %35, %37 : vector<8x128xf32>
    %cst_21 = arith.constant 0.000000e+00 : f32
    %39 = vector.broadcast %cst_21 : f32 to vector<8x128xf32>
    %40 = arith.maximumf %38, %39 : vector<8x128xf32>
    %c0_22 = arith.constant 0 : index
    %c0_23 = arith.constant 0 : index
    %41 = vector.load %arg8[%c0_22, %c0_23] : memref<8x128xf32, #tpu.memory_space<vmem>>, vector<8x128xf32>
    tpu.vector_store %arg8[%c0_22, %c0_23], %40 {strides = array<i32>} : memref<8x128xf32, #tpu.memory_space<vmem>>, vector<8x128xf32>,
    return
  }
  func.func @transform_0(%arg0: i32) -> (i32, i32) {
    %c0_i32 = arith.constant 0 : i32
    %c0_i32_0 = arith.constant 0 : i32
    return %arg0, %c0_i32 : i32, i32
  }
  func.func @transform_1(%arg0: i32) -> (i32, i32) {
    %c0_i32 = arith.constant 0 : i32
    %c0_i32_0 = arith.constant 0 : i32
    return %arg0, %c0_i32 : i32, i32
  }
  func.func @transform_2(%arg0: i32) -> (i32, i32) {
    %c0_i32 = arith.constant 0 : i32
    %c0_i32_0 = arith.constant 0 : i32
    %c0_i32_1 = arith.constant 0 : i32
    return %c0_i32, %c0_i32_0 : i32, i32
  }
  func.func @transform_3(%arg0: i32) -> (i32, i32) {
    %c0_i32 = arith.constant 0 : i32
    %c0_i32_0 = arith.constant 0 : i32
    %c0_i32_1 = arith.constant 0 : i32
    return %c0_i32, %c0_i32_0 : i32, i32
  }
  func.func @transform_4(%arg0: i32) -> (i32, i32) {
    %c0_i32 = arith.constant 0 : i32
    %c0_i32_0 = arith.constant 0 : i32
    %c0_i32_1 = arith.constant 0 : i32
    return %c0_i32, %c0_i32_0 : i32, i32
  }
  func.func @transform_5(%arg0: i32) -> (i32, i32) {
    %c0_i32 = arith.constant 0 : i32
    %c0_i32_0 = arith.constant 0 : i32
    %c0_i32_1 = arith.constant 0 : i32
    return %c0_i32, %c0_i32_0 : i32, i32
  }
  func.func @transform_6(%arg0: i32) -> (i32, i32) {
    %c0_i32 = arith.constant 0 : i32
    %c0_i32_0 = arith.constant 0 : i32
    %c0_i32_1 = arith.constant 0 : i32
    return %c0_i32, %c0_i32_0 : i32, i32
  }
  func.func @transform_7(%arg0: i32) -> (i32, i32) {
    %c0_i32 = arith.constant 0 : i32
    %c0_i32_0 = arith.constant 0 : i32
    return %arg0, %c0_i32 : i32, i32
  }
}

</mosaic_0001>

<bundles_post_ra>
// kernel: _deepset_impl.1
= control target key start
LH: loop header
LB: loop body
LE: loop exit
PB: predicated region body
PF: predicated region fallthrough
CT: control target
= control target key end

     0   :  { %12 = vsyncpa [#allocation3], 0  ;;  %s1696_s0 = inlined_call_operand.vmem [shape: bf16[128,128], index: 0, kind: input, shape index: {}]   ;;  %s1697_s1 = inlined_call_operand.vmem [shape: f32[16,8], index: 1, kind: input, shape index: {}]   ;;  %s1698_s2 = inlined_call_operand.vmem [shape: bf16[128,128], index: 2, kind: input, shape index: {}]   ;;  %s1699_s3 = inlined_call_operand.vmem [shape: bf16[128,128], index: 3, kind: input, shape index: {}]   ;;  %s1700_s4 = inlined_call_operand.vmem [shape: bf16[128,128], index: 4, kind: input, shape index: {}]   ;;  %s1701_s5 = inlined_call_operand.vmem [shape: bf16[128,128], index: 5, kind: input, shape index: {}]   ;;  %s1702_s6 = inlined_call_operand.vmem [shape: f32[8,128], index: 6, kind: input, shape index: {}]   ;;  %s1703_s7 = inlined_call_operand.hbm [shape: f32[16,128], index: 7, kind: output, shape index: {}]  }
   0x1   :  { %14 = vsyncpa [#allocation3 + $0x1], 0  ;;  %s1442_s24 = smov 0   ;;  %s1444_s25 = smov 0  }
   0x2   :  { %s1446_s26 = smov 0   ;;  %s1448_s27 = smov 0  }
   0x3 LB: > { %s1463_s28 = sadd.s32 4294967295, %s1397_s27   ;;  %s1082_s29 = sadd.s32 4294967294, %s1397_s27   ;;  %s1397_s27 = sphi %s1448_s27, %s1709_s27   ;;  %s1393_s26 = sphi %s1446_s26, %s1708_s26   ;;  %s1389_s25 = sphi %s1444_s25, %s1707_s25   ;;  %s1385_s24 = sphi %s1442_s24, %s1706_s24  }
   0x4   : > { %s1467_s30 = sadd.s32 1, %s1397_s27   ;;  %s184_s8 = sadd.s32 1, %s1393_s26 }
   0x5   : > { %s181_s9 = ssub.s32 %s1397_s27, %s1467_s30  ;;  %p194_p0 = scmp.ne.s32.totalorder %s1393_s26, %s1389_s25 }
   0x6   : > { %p182_p1 = scmp.eq.s32.totalorder %s181_s9, 0  ;;  %p195_p2 = scmp.eq.s32.totalorder %s1463_s28, 1 }
   0x7   : > { %p200_p3 = scmp.ne.s32.totalorder %s1389_s25, %s1385_s24  ;;  %p201_p4 = scmp.eq.s32.totalorder %s1082_s29, 1 }
   0x8   : > { %s1478_s10 = scalar_select %p182_p1, %s1393_s26, %s184_s8  }
   0x9   : > { %p1480_p5 = por %p195_p2, %p194_p0  ;;  %p1484_p6 = por %p201_p4, %p200_p3 }
   0xa   : > { %p1085_p7 = scmp.ge.s32.totalorder %s1397_s27, 1  ;;  %p250_p8 = scmp.lt.s32.totalorder %s1397_s27, 3 }
   0xc   : > { %p251_p9 = pnand %p1085_p7, %p250_p8 }
   0xd   : > { %s1087_s15 = sshll.u32 (!%p251_p9), %s1463_s28, 3  ;;  %p292_p11 = scmp.lt.s32.totalorder (!%p251_p9), %s1463_s28, 1 }
   0xe   : > { %254 = sbr.rel (%p251_p9) target bundleno = 905 (0x389), region = 48  ;;  %p287_p10 = scmp.lt.s32.totalorder (!%p251_p9), %s1087_s15, 15 }
   0xf   : > { %s1127_s22 = sshll.u32 (!%p251_p9), %s1463_s28, 7 }
  0x13   : > { %v1301_v0 = vld [vmem:[%s1698_s2 + $0x38] sm:$0xff]   ;;  %v1302_v1 = vld [vmem:[%s1698_s2 + $0x30] sm:$0xff]   ;;  %s1711_s15 = smov (!%p287_p10, %s1087_s15), 15  ;;  %v1303_v2 = vld [vmem:[%s1698_s2 + $0x28] sm:$0xff]   ;;  %v322_v20 = vlaneseq  ;;  %vm1400_vm0 = vmmov 0   ;;  %vm781_vm1 = vcmask 1041409  }
  0x14   : > { %1172 = vmatprep.subr.bf16.mxu0 %v1301_v0  ;;  %s1088_s20 = sshll.u32 %s1711_s15, 2  ;;  %v1304_v3 = vld [vmem:[%s1698_s2 + $0x20] sm:$0xff]   ;;  %v1305_v5 = vld [vmem:[%s1698_s2 + $0x18] sm:$0xff]   ;;  %v1314_v7 = vld [vmem:[%s1699_s3 + $0x30] sm:$0xff]   ;;  %vm783_vm2 = vcmask 1042434   ;;  %vm785_vm3 = vcmask 1043459  }
  0x15   : > { %1173 = vmatpush3.bf16.msra.mxu0 %v1301_v0  ;;  %s1503_s23 = scalar_lea.vmem %s1696_s0, %s1088_s20  ;;  %v1313_v6 = vld [vmem:[%s1699_s3 + $0x38] sm:$0xff]   ;;  %v1306_v8 = vld [vmem:[%s1698_s2 + $0x10] sm:$0xff]   ;;  %v1315_v9 = vld [vmem:[%s1699_s3 + $0x28] sm:$0xff]   ;;  %v1549_v21 = vshrl.u32 %v322_v20, 7  ;;  %vm787_vm4 = vcmask 1044484   ;;  %vm789_vm5 = vcmask 1045509  }
  0x16   : > { %1174 = vmatprep.subr.bf16.mxu0 %v1302_v1  ;;  %v1309_v4 = vld [vmem:[%s1503_s23] sm:$0xff]   ;;  %1196 = vmatprep.subr.bf16.mxu1 %v1313_v6  ;;  %v1307_v10 = vld [vmem:[%s1698_s2 + $0x8] sm:$0xff]   ;;  %v1317_v13 = vld [vmem:[%s1699_s3 + $0x18] sm:$0xff]   ;;  %vm791_vm6 = vcmask 1046534   ;;  %vm793_vm7 = vcmask 1047559   ;;  %s283_s20 = sand.u32 1, %s1389_s25  }
  0x17   : > { %1188 = vmatprep.mubr.bf16.mxu0 %v1309_v4  ;;  %1197 = vmatpush3.bf16.msra.mxu1 %v1313_v6  ;;  %v1316_v11 = vld [vmem:[%s1699_s3 + $0x20] sm:$0xff]   ;;  %v1310_v14 = vld [vmem:[%s1503_s23 + $0x8] sm:$0xff]   ;;  %v1311_v15 = vld [vmem:[%s1503_s23 + $0x10] sm:$0xff]   ;;  %v633_v22 = vsub.s32 2, %v1549_v21  ;;  %v324_v23 = vsub.s32 0, %v1549_v21  ;;  %v493_v24 = vsub.s32 1, %v1549_v21 }
  0x18   : > { %1198 = vmatprep.subr.bf16.mxu1 %v1314_v7  ;;  %v1308_v12 = vld [vmem:[%s1698_s2] sm:$0xff]   ;;  %v1312_v16 = vld [vmem:[%s1503_s23 + $0x18] sm:$0xff]   ;;  %v1318_v17 = vld [vmem:[%s1699_s3 + $0x10] sm:$0xff]   ;;  %s293_s23 = scalar_select %p292_p11, %s1463_s28, 1  ;;  %v640_v25 = vsub.s32 3, %v1549_v21  ;;  %v647_v31 = vsub.s32 4, %v1549_v21 }
  0x19   : > { %1175 = vmatpush3.bf16.msra.mxu0 %v1302_v1  ;;  %v1319_v18 = vld [vmem:[%s1699_s3 + $0x8] sm:$0xff]   ;;  %v1320_v19 = vld [vmem:[%s1699_s3] sm:$0xff]   ;;  %v654_v32 = vsub.s32 5, %v1549_v21  ;;  %v661_v35 = vsub.s32 6, %v1549_v21  ;;  %v668_v36 = vsub.s32 7, %v1549_v21  ;;  %v1399_v6 = vmov 0.0  }
  0x1a   : > { %1176 = vmatprep.subr.bf16.mxu0 %v1303_v2  ;;  %s1089_s29 = sshll.u32 %s293_s23, 3  ;;  %v1572_v39 = vld [vmem:[%s1702_s6] sm:$0xff]  ;;  %s1086_s21 = sshll.u32 %s283_s20, 3 }
  0x1b   : > { %1199 = vmatpush3.bf16.msra.mxu1 %v1314_v7  ;;  %s295_s13 = scalar_lea.vmem %s1697_s1, %s1089_s29  ;;  %v325_v41 = vrot.slane %v1572_v39, %v324_v23  ;;  %v1322_v7 = vld [vmem:[%s1700_s4 + $0x30] sm:$0xff]   ;;  %s285_s23 = scalar_lea.vmem [#allocation2], %s1086_s21 }
  0x1c   : > { %1200 = vmatprep.subr.bf16.mxu1 %v1315_v9  ;;  %v616_v26 = vld [vmem:[%s295_s13] sm:$0xff]  ;;  %s1011_s29 = sshll.u32 %s285_s23, 4  ;;  %s1655_s13 = scalar_lea.hbm %s1703_s7, %s1127_s22  ;;  %s1657_s29 = int_to_ptr.vmem [resolvable:$true] %s1011_s29 }
  0x1d   : > { %1177 = vmatpush3.bf16.msra.mxu0 %v1303_v2  ;;  %v620_v27 = vrot.slane %v616_v26, %v324_v23  ;;  %v634_v28 = vrot.slane %v616_v26, %v633_v22  ;;  %v627_v29 = vrot.slane %v616_v26, %v493_v24  ;;  %v641_v30 = vrot.slane %v616_v26, %v640_v25  ;;  %s998_s14 = scalar_lea.sflag [#allocation3], %s283_s20  ;;  %s1337_s28 = scalar_lea.vmem %s1657_s29, 128 }
  0x1e   : > { %1178 = vmatprep.subr.bf16.mxu0 %v1304_v3  ;;  %v648_v33 = vrot.slane %v616_v26, %v647_v31  ;;  %v655_v34 = vrot.slane %v616_v26, %v654_v32  ;;  %v662_v37 = vrot.slane %v616_v26, %v661_v35  ;;  %v669_v38 = vrot.slane %v616_v26, %v668_v36  ;;  %p1338_p12 = scmp.ne.s32.totalorder %s1657_s29, %s1337_s28  ;;  %s1401_s15 = smov [#allocation2]  }
  0x1f   : > { %1201 = vmatpush3.bf16.msra.mxu1 %v1315_v9  ;;  %622 = vbcast.lane.b32.xlu0 %v620_v27, 256  ;;  %v1324_v9 = vld [vmem:[%s1700_s4 + $0x20] sm:$0xff]   ;;  %v494_v23 = vrot.slane %v1572_v39, %v493_v24  ;;  %s1341_s16 = sshll.u32 %s1401_s15, 4  ;;  %s1342_s16 = int_to_ptr.vmem [resolvable:$false] %s1341_s16 }
  0x20   : > { %1202 = vmatprep.subr.bf16.mxu1 %v1316_v11  ;;  %636 = vbcast.lane.b32.xlu1 %v634_v28, 256  ;;  %p1339_p13 = pnand %p1338_p12, %p1480_p5  ;;  %s1343_s17 = scalar_lea.vmem %s1342_s16, 256 }
  0x21   : > { %1179 = vmatpush3.bf16.msra.mxu0 %v1304_v3  ;;  %p1344_p1 = scmp.lt.s32.totalorder %s1657_s29, %s1342_s16  ;;  %p1345_p2 = scmp.lt.s32.totalorder %s1343_s17, %s1337_s28 }
  0x22   : > { %1180 = vmatprep.subr.bf16.mxu0 %v1305_v5  ;;  %p1340_p0 = pneg %p1339_p13 }
  0x23   : > { %1203 = vmatpush3.bf16.msra.mxu1 %v1316_v11  ;;  %629 = vbcast.lane.b32.xlu0 %v627_v29, 256  ;;  %v1326_v11 = vld [vmem:[%s1700_s4 + $0x10] sm:$0xff]   ;;  %p1346_p3 = por %p1345_p2, %p1344_p1 }
  0x24   : > { %1204 = vmatprep.subr.bf16.mxu1 %v1317_v13  ;;  %643 = vbcast.lane.b32.xlu1 %v641_v30, 256 }
  0x25   : > { %1181 = vmatpush3.bf16.msra.mxu0 %v1305_v5  ;;  %v1321_v5 = vld [vmem:[%s1700_s4 + $0x38] sm:$0xff]   ;;  %p1347_p4 = pnand %p1346_p3, %p1340_p0 }
  0x26   : > { %1182 = vmatprep.subr.bf16.mxu0 %v1306_v8 }
  0x27   : > { %1205 = vmatpush3.bf16.msra.mxu1 %v1317_v13  ;;  %650 = vbcast.lane.b32.xlu0 %v648_v33, 256  ;;  %v1328_v13 = vld [vmem:[%s1700_s4] sm:$0xff]  }
  0x28   : > { %1206 = vmatprep.subr.bf16.mxu1 %v1318_v17  ;;  %657 = vbcast.lane.b32.xlu1 %v655_v34, 256 }
  0x29   : > { %1183 = vmatpush3.bf16.msra.mxu0 %v1306_v8  ;;  %v1323_v8 = vld [vmem:[%s1700_s4 + $0x28] sm:$0xff]  }
  0x2a   : > { %1184 = vmatprep.subr.bf16.mxu0 %v1307_v10 }
  0x2b   : > { %1207 = vmatpush3.bf16.msra.mxu1 %v1318_v17  ;;  %664 = vbcast.lane.b32.xlu0 %v662_v37, 256  ;;  %v1332_v17 = vld [vmem:[%s1701_s5 + $0x20] sm:$0xff]  }
  0x2c   : > { %1208 = vmatprep.subr.bf16.mxu1 %v1319_v18  ;;  %671 = vbcast.lane.b32.xlu1 %v669_v38, 256 }
  0x2d   : > { %1185 = vmatpush3.bf16.msra.mxu0 %v1307_v10  ;;  %v1325_v10 = vld [vmem:[%s1700_s4 + $0x18] sm:$0xff]  }
  0x2e   : > { %1186 = vmatprep.subr.bf16.mxu0 %v1308_v12 }
  0x2f   : > { %1209 = vmatpush3.bf16.msra.mxu1 %v1319_v18  ;;  %v1333_v18 = vld [vmem:[%s1701_s5 + $0x18] sm:$0xff]  }
  0x30   : > { %1210 = vmatprep.subr.bf16.mxu1 %v1320_v19 }
  0x31   : > { %1187 = vmatpush3.bf16.msra.mxu0 %v1308_v12  ;;  %v1327_v12 = vld [vmem:[%s1700_s4 + $0x8] sm:$0xff]  }
  0x32   : > { %1220 = vmatprep.subr.bf16.mxu0 %v1399_v6 }
  0x33   : > { %1211 = vmatpush3.bf16.msra.mxu1 %v1320_v19  ;;  %v1334_v19 = vld [vmem:[%s1701_s5 + $0x10] sm:$0xff]  }
  0x34   : > { %1189 = vmatmul.mubr.bf16.vlgmr.msra.gmra.mxu0 %v1310_v14  ;;  %1240 = vmatprep.subr.bf16.mxu1 %v1399_v6  ;;  %v1329_v14 = vld [vmem:[%s1701_s5 + $0x38] sm:$0xff]  }
  0x35   : > { %1192 = vmatprep.mubr.bf16.mxu0 %v1311_v15  ;;  %1221 = vmatpush3.bf16.msra.mxu0 %v1321_v5  ;;  %v1330_v15 = vld [vmem:[%s1701_s5 + $0x30] sm:$0xff]  }
  0x36   : > { %1222 = vmatprep.subr.bf16.mxu0 %v1399_v6 }
  0x39   : > { %1223 = vmatpush3.bf16.msra.mxu0 %v1322_v7 }
  0x3a   : > { %1224 = vmatprep.subr.bf16.mxu0 %v1399_v6 }
  0x3c   : > { %1193 = vmatmul.mubr.bf16.gmra.mxu0 %v1312_v16  ;;  %v1331_v16 = vld [vmem:[%s1701_s5 + $0x28] sm:$0xff]  }
  0x3d   : > { %1225 = vmatpush3.bf16.msra.mxu0 %v1323_v8  ;;  %1236 = vmatprep.mubr.msk.bf16.mxu0 %vm1400_vm0, %v1399_v6 }
  0x3e   : > { %1226 = vmatprep.subr.bf16.mxu0 %v1399_v6 }
  0x41   : > { %1227 = vmatpush3.bf16.msra.mxu0 %v1324_v9 }
  0x42   : > { %1228 = vmatprep.subr.bf16.mxu0 %v1399_v6 }
  0x45   : > { %1229 = vmatpush3.bf16.msra.mxu0 %v1325_v10 }
  0x46   : > { %1230 = vmatprep.subr.bf16.mxu0 %v1399_v6 }
  0x49   : > { %1231 = vmatpush3.bf16.msra.mxu0 %v1326_v11 }
  0x4a   : > { %1232 = vmatprep.subr.bf16.mxu0 %v1399_v6 }
  0x4d   : > { %1233 = vmatpush3.bf16.msra.mxu0 %v1327_v12 }
  0x4e   : > { %1234 = vmatprep.subr.bf16.mxu0 %v1399_v6 }
  0x51   : > { %1235 = vmatpush3.bf16.msra.mxu0 %v1328_v13 }
  0x91   : > { %v623_v20 = vpop.permute.xlu0 %622 }
  0x92   : > { %v637_v26 = vpop.permute.xlu1 %636 }
  0x95   : > { %v630_v27 = vpop.permute.xlu0 %629 }
  0x96   : > { %v644_v33 = vpop.permute.xlu1 %643 }
  0x99   : > { %v651_v38 = vpop.permute.xlu0 %650 }
  0xf4   : > { %v1190_v40 = vpop.f32.mrf.mxu0 }
  0xf5   : > { %v441_v46 = vadd.f32 %v1190_v40, %v325_v41 }
  0xf6   : > { %v432_v42 = vpop.f32.mrf.mxu0 }
  0xf7   : > { %v433_v44 = vadd.f32 %v432_v42, %v325_v41  ;;  %v465_v53 = vmax.f32 %v441_v46, 0.0 }
  0xf8   : > { %v1191_v43 = vpop.f32.mrf.mxu0 }
  0xf9   : > { %v444_v45 = vadd.f32 %v1191_v43, %v325_v41  ;;  %v463_v51 = vmax.f32 %v433_v44, 0.0 }
  0xfa   : > { %v435_v47 = vpop.f32.mrf.mxu0 }
  0xfb   : > { %v436_v48 = vadd.f32 %v435_v47, %v325_v41  ;;  %v466_v49 = vmax.f32 %v444_v45, 0.0 }
  0xfc   : > { %v1194_v50 = vpop.f32.mrf.mxu0 }
  0xfd   : > { %v464_v52 = vmax.f32 %v436_v48, 0.0  ;;  %v472_v56 = vpack.c.bf16 %v466_v49, %v465_v53  ;;  %v457_v60 = vadd.f32 %v1194_v50, %v325_v41  ;;  %v658_v49 = vpop.permute.xlu1 %657 }
  0xfe   : > { %v448_v54 = vpop.f32.mrf.mxu0 }
  0xff   : > { %v471_v55 = vpack.c.bf16 %v464_v52, %v463_v51  ;;  %v449_v58 = vadd.f32 %v448_v54, %v325_v41  ;;  %v469_v2 = vmax.f32 %v457_v60, 0.0 }
 0x100   : > { %v1195_v57 = vpop.f32.mrf.mxu0 }
 0x101   : > { %v460_v59 = vadd.f32 %v1195_v57, %v325_v41  ;;  %1212 = vmatprep.mubr.bf16.mxu1 %v471_v55  ;;  %v467_v0 = vmax.f32 %v449_v58, 0.0  ;;  %v672_v9 = vpop.permute.xlu1 %671 }
 0x102   : > { %v451_v61 = vpop.f32.mrf.mxu0  ;;  %1213 = vmatmul.mubr.bf16.vlgmr.msra.gmra.mxu1 %v472_v56  ;;  %v665_v56 = vpop.permute.xlu0 %664 }
 0x103   : > { %v452_v62 = vadd.f32 %v451_v61, %v325_v41  ;;  %v470_v63 = vmax.f32 %v460_v59, 0.0  ;;  %1241 = vmatpush3.bf16.msra.mxu1 %v1329_v14 }
 0x104   : > { %1242 = vmatprep.subr.bf16.mxu1 %v1399_v6 }
 0x105   : > { %v468_v1 = vmax.f32 %v452_v62, 0.0  ;;  %v474_v4 = vpack.c.bf16 %v470_v63, %v469_v2 }
 0x107   : > { %v473_v3 = vpack.c.bf16 %v468_v1, %v467_v0  ;;  %1243 = vmatpush3.bf16.msra.mxu1 %v1330_v15 }
 0x108   : > { %1244 = vmatprep.subr.bf16.mxu1 %v1399_v6 }
 0x109   : > { %1216 = vmatprep.mubr.bf16.mxu1 %v473_v3 }
 0x10a   : > { %1217 = vmatmul.mubr.bf16.gmra.mxu1 %v474_v4 }
 0x10b   : > { %1256 = vmatprep.mubr.msk.bf16.mxu1 %vm1400_vm0, %v1399_v6  ;;  %1245 = vmatpush3.bf16.msra.mxu1 %v1331_v16 }
 0x10c   : > { %1246 = vmatprep.subr.bf16.mxu1 %v1399_v6 }
 0x10f   : > { %1247 = vmatpush3.bf16.msra.mxu1 %v1332_v17 }
 0x110   : > { %1248 = vmatprep.subr.bf16.mxu1 %v1399_v6 }
 0x113   : > { %1249 = vmatpush3.bf16.msra.mxu1 %v1333_v18 }
 0x114   : > { %1250 = vmatprep.subr.bf16.mxu1 %v1399_v6 }
 0x117   : > { %1251 = vmatpush3.bf16.msra.mxu1 %v1334_v19 }
 0x118   : > { %1252 = vmatprep.subr.bf16.mxu1 %v1399_v6 }
 0x1c2   : > { %v1214_v28 = vpop.f32.mrf.mxu1 }
 0x1c3   : > { %v586_v29 = vadd.f32 %v1214_v28, %v494_v23 }
 0x1c4   : > { %v577_v30 = vpop.f32.mrf.mxu1 }
 0x1c5   : > { %v610_v31 = vmax.f32 %v586_v29, 0.0  ;;  %v578_v32 = vadd.f32 %v577_v30, %v494_v23 }
 0x1c6   : > { %v1215_v34 = vpop.f32.mrf.mxu1 }
 0x1c7   : > { %v608_v35 = vmax.f32 %v578_v32, 0.0  ;;  %v675_v36 = vmul.f32 %v637_v26, %v610_v31  ;;  %v589_v37 = vadd.f32 %v1215_v34, %v494_v23 }
 0x1c8   : > { %v580_v40 = vpop.f32.mrf.mxu1 }
 0x1c9   : > { %v673_v41 = vmul.f32 %v623_v20, %v608_v35  ;;  %v693_v42 = vrot.slane %v675_v36, 4  ;;  %v611_v43 = vmax.f32 %v589_v37, 0.0  ;;  %v581_v44 = vadd.f32 %v580_v40, %v494_v23 }
 0x1ca   : > { %v1218_v45 = vpop.f32.mrf.mxu1 }
 0x1cb   : > { %v681_v24 = vrot.slane %v673_v41, 4  ;;  %v694_v46 = vadd.f32 %v693_v42, %v675_v36  ;;  %v609_v47 = vmax.f32 %v581_v44, 0.0  ;;  %v676_v48 = vmul.f32 %v644_v33, %v611_v43 }
 0x1cc   : > { %v602_v50 = vadd.f32 %v1218_v45, %v494_v23  ;;  %v593_v51 = vpop.f32.mrf.mxu1 }
 0x1cd   : > { %v682_v52 = vadd.f32 %v681_v24, %v673_v41  ;;  %v695_v53 = vrot.slane %v694_v46, 2  ;;  %v674_v54 = vmul.f32 %v630_v27, %v609_v47  ;;  %v699_v55 = vrot.slane %v676_v48, 4 }
 0x1ce   : > { %v614_v57 = vmax.f32 %v602_v50, 0.0  ;;  %v594_v58 = vadd.f32 %v593_v51, %v494_v23  ;;  %v1219_v59 = vpop.f32.mrf.mxu1 }
 0x1cf   : > { %v683_v60 = vrot.slane %v682_v52, 2  ;;  %v696_v61 = vadd.f32 %v695_v53, %v694_v46  ;;  %v687_v62 = vrot.slane %v674_v54, 4  ;;  %v700_v63 = vadd.f32 %v699_v55, %v676_v48 }
 0x1d0   : > { %v612_v0 = vmax.f32 %v594_v58, 0.0  ;;  %v679_v1 = vmul.f32 %v665_v56, %v614_v57  ;;  %v605_v2 = vadd.f32 %v1219_v59, %v494_v23  ;;  %v596_v3 = vpop.f32.mrf.mxu1 }
 0x1d1   : > { %v684_v4 = vadd.f32 %v683_v60, %v682_v52  ;;  %v697_v5 = vrot.slane %v696_v61, 1  ;;  %v688_v7 = vadd.f32 %v687_v62, %v674_v54  ;;  %v701_v8 = vrot.slane %v700_v63, 2 }
 0x1d2   : > { %v677_v10 = vmul.f32 %v651_v38, %v612_v0  ;;  %v717_v11 = vrot.slane %v679_v1, 4  ;;  %v615_v12 = vmax.f32 %v605_v2, 0.0  ;;  %v597_v13 = vadd.f32 %v596_v3, %v494_v23 }
 0x1d3   : > { %v685_v14 = vrot.slane %v684_v4, 1  ;;  %v689_v15 = vrot.slane %v688_v7, 2  ;;  %v702_v16 = vadd.f32 %v701_v8, %v700_v63  ;;  %v698_v27 = vadd.f32 %v697_v5, %v696_v61 }
 0x1d4   : > { %v705_v17 = vrot.slane %v677_v10, 4  ;;  %v718_v18 = vadd.f32 %v717_v11, %v679_v1  ;;  %v613_v19 = vmax.f32 %v597_v13, 0.0  ;;  %v680_v20 = vmul.f32 %v672_v9, %v615_v12 }
 0x1d5   : > { %v686_v26 = vadd.f32 %v685_v14, %v684_v4  ;;  %v690_v28 = vadd.f32 %v689_v15, %v688_v7  ;;  %v703_v29 = vrot.slane %v702_v16, 1  ;;  %v731_v41 = vmul.f32 0.125, %v698_v27 }
 0x1d6   : > { %v706_v30 = vadd.f32 %v705_v17, %v677_v10  ;;  %v719_v31 = vrot.slane %v718_v18, 2  ;;  %v678_v32 = vmul.f32 %v658_v49, %v613_v19  ;;  %v723_v33 = vrot.slane %v680_v20, 4 }
 0x1d7   : > { %v729_v34 = vmul.f32 0.125, %v686_v26  ;;  %v691_v35 = vrot.slane %v690_v28, 1  ;;  %v704_v36 = vadd.f32 %v703_v29, %v702_v16  ;;  %v739_v52 = vpack.c.bf16 %v731_v41, %v731_v41  ;;  %v1336_v29 = vld [vmem:[%s1701_s5] sm:$0xff]  }
 0x1d8   : > { %v707_v37 = vrot.slane %v706_v30, 2  ;;  %v720_v23 = vadd.f32 %v719_v31, %v718_v18  ;;  %v711_v38 = vrot.slane %v678_v32, 4  ;;  %v724_v40 = vadd.f32 %v723_v33, %v680_v20 }
 0x1d9   : > { %v692_v42 = vadd.f32 %v691_v35, %v690_v28  ;;  %v737_v46 = vpack.c.bf16 %v729_v34, %v729_v34  ;;  %v732_v48 = vmul.f32 0.125, %v704_v36  ;;  %v775_v0 = vunpack.c.l.b16 %v739_v52  ;;  %v1335_v28 = vld [vmem:[%s1701_s5 + $0x8] sm:$0xff]  }
 0x1da   : > { %v708_v43 = vadd.f32 %v707_v37, %v706_v30  ;;  %v721_v44 = vrot.slane %v720_v23, 1  ;;  %v712_v45 = vadd.f32 %v711_v38, %v678_v32  ;;  %v725_v24 = vrot.slane %v724_v40, 2  ;;  %1253 = vmatpush3.bf16.msra.mxu1 %v1335_v28 }
 0x1db   : > { %v730_v47 = vmul.f32 0.125, %v692_v42  ;;  %v773_v58 = vunpack.c.l.b16 %v737_v46  ;;  %v740_v60 = vpack.c.bf16 %v732_v48, %v732_v48  ;;  %1254 = vmatprep.subr.bf16.mxu1 %v1399_v6  ;;  %v764_v30 = vrot.slane %v1572_v39, %v633_v22 }
 0x1dc   : > { %v709_v50 = vrot.slane %v708_v43, 1  ;;  %v713_v51 = vrot.slane %v712_v45, 2  ;;  %v726_v49 = vadd.f32 %v725_v24, %v724_v40  ;;  %v722_v54 = vadd.f32 %v721_v44, %v720_v23 }
 0x1dd   : > { %v738_v53 = vpack.c.bf16 %v730_v47, %v730_v47  ;;  %v776_v8 = vunpack.c.l.b16 %v740_v60  ;;  %v906_v6 = vrot.slane %v1572_v39, %v640_v25 }
 0x1de   : > { %v710_v55 = vadd.f32 %v709_v50, %v708_v43  ;;  %v714_v56 = vadd.f32 %v713_v51, %v712_v45  ;;  %v727_v57 = vrot.slane %v726_v49, 1  ;;  %v735_v2 = vmul.f32 0.125, %v722_v54  ;;  %1255 = vmatpush3.bf16.msra.mxu1 %v1336_v29 }
 0x1df   : > { %v774_v59 = vunpack.c.l.b16 %v738_v53 }
 0x1e0   : > { %v733_v61 = vmul.f32 0.125, %v710_v55  ;;  %v715_v62 = vrot.slane %v714_v56, 1  ;;  %v728_v63 = vadd.f32 %v727_v57, %v726_v49  ;;  %v743_v11 = vpack.c.bf16 %v735_v2, %v735_v2 }
 0x1e1   : > { %v782_v1 = vsel %vm781_vm1, %v774_v59, %v773_v58 }
 0x1e2   : > { %v741_v3 = vpack.c.bf16 %v733_v61, %v733_v61  ;;  %v716_v4 = vadd.f32 %v715_v62, %v714_v56  ;;  %v784_v5 = vsel %vm783_vm2, %v775_v0, %v782_v1  ;;  %v736_v7 = vmul.f32 0.125, %v728_v63 }
 0x1e3   : > { %v786_v12 = vsel %vm785_vm3, %v776_v8, %v784_v5  ;;  %v779_v17 = vunpack.c.l.b16 %v743_v11 }
 0x1e4   : > { %v734_v9 = vmul.f32 0.125, %v716_v4  ;;  %v777_v10 = vunpack.c.l.b16 %v741_v3  ;;  %v744_v14 = vpack.c.bf16 %v736_v7, %v736_v7 }
 0x1e6   : > { %v742_v13 = vpack.c.bf16 %v734_v9, %v734_v9  ;;  %v788_v16 = vsel %vm787_vm4, %v777_v10, %v786_v12  ;;  %v780_v19 = vunpack.c.l.b16 %v744_v14 }
 0x1e8   : > { %v778_v15 = vunpack.c.l.b16 %v742_v13 }
 0x1ea   : > { %v790_v18 = vsel %vm789_vm5, %v778_v15, %v788_v16 }
 0x1eb   : > { %v792_v20 = vsel %vm791_vm6, %v779_v17, %v790_v18 }
 0x1ec   : > { %v794_v26 = vsel %vm793_vm7, %v780_v19, %v792_v20 }
 0x1ed   : > { %v795_v27 = vpack.c.b16 %v794_v26, %v794_v26 }
 0x1ef   : > { %1237 = vmatmul.mubr.bf16.vlgmr.msra.gmra.mxu0 %v795_v27 }
 0x2af   : > { %v879_v31 = vpop.f32.mrf.mxu0 }
 0x2b0   : > { %v880_v32 = vadd.f32 %v879_v31, %v764_v30 }
 0x2b1   : > { %v1238_v33 = vpop.f32.mrf.mxu0 }
 0x2b2   : > { %v885_v34 = vmax.f32 %v880_v32, 0.0 }
 0x2b3   : > { %v882_v35 = vpop.f32.mrf.mxu0 }
 0x2b4   : > { %v886_v36 = vpack.c.bf16 %v885_v34, %v885_v34 }
 0x2b5   : > { %v1239_v37 = vpop.f32.mrf.mxu0 }
 0x2b6   : > { %1257 = vmatmul.mubr.bf16.vlgmr.msra.gmra.mxu1 %v886_v36 }
 0x376   : > { %v989_v23 = vpop.f32.mrf.mxu1 }
 0x377   : > { %v990_v22 = vadd.f32 %v989_v23, %v906_v6 }
 0x378   : > { %v1258_v38 = vpop.f32.mrf.mxu1 }
 0x379   : > { %v995_v40 = vmax.f32 %v990_v22, 0.0 }
 0x37a   : > { %v992_v21 = vpop.f32.mrf.mxu1 }
 0x37b   : > { %996 = vst [vmem:[%s285_s23] sm:$0xff] %v995_v40 }
 0x37c   : > { %v1259_v25 = vpop.f32.mrf.mxu1 }
 0x37d   : > { %1350 = shalt.err (!%p1347_p4)
}
 0x37e   : > { %s1351_s18 = scalar_lea.hbm %s1655_s13, 128  ;;  %s1355_s21 = scalar_lea.hbm %s1703_s7, 256 }
 0x37f   : > { %p1352_p7 = scmp.ne.s32.totalorder %s1655_s13, %s1351_s18  ;;  %p1356_p10 = scmp.lt.s32.totalorder %s1655_s13, %s1703_s7 }
 0x380   : > { %p1357_p11 = scmp.lt.s32.totalorder %s1355_s21, %s1351_s18 }
 0x381   : > { %p1353_p8 = pnand %p1352_p7, %p1480_p5 }
 0x382   : > { %p1358_p12 = por %p1357_p11, %p1356_p10 }
 0x383   : > { %p1354_p9 = pneg %p1353_p8 }
 0x385   : > { %p1359_p13 = pnand %p1358_p12, %p1354_p9 }
 0x387   : > { %1362 = shalt.err (!%p1359_p13)
}
 0x388   : > { %1260 = dma.vmem_to_hbm [thread:$0]  (%p1480_p5), %s1657_s29, 128, %s1655_s13, %s998_s14  }
 0x389 PF: > { %p1266_p0 = scmp.ge.s32.totalorder %s1397_s27, 2  ;;  %s1023_s8 = sand.u32 1, %s1385_s24  }
 0x38a   : > { %s1024_s9 = scalar_lea.sflag [#allocation3], %s1023_s8 }
 0x38b   : > { %p1263_p1 = pnand %p1266_p0, %p1484_p6 }
 0x38d   : > { %p1264_p2 = pneg %p1263_p1 }
 0x38f   : > { %1380 = dma.done.wait (%p1264_p2), %s1024_s9, 128  }
 0x390   : > { %1382 = vsyncadd (%p1264_p2), %s1024_s9, 4294967168  ;;  %p17_p3 = scmp.ge.s32.totalorder %s1467_s30, 4   ;;  %s1706_s24 = smov %s1389_s25 }
 0x391   : > { %s1707_s25 = smov %s1393_s26  ;;  %s1708_s26 = smov %s1478_s10 }
 0x392   : > { %s1709_s27 = smov %s1467_s30  ;;  %19 = sbr.rel (!%p17_p3) target bundleno = 3 (0x3), region = 86 }
 0x397   :  { %1029 = vsyncpa [#allocation3], 1 }
 0x398   :  { %1031 = vsyncpa [#allocation3 + $0x1], 1 }

// kernel: _deepset_impl.1
= control target key start
LH: loop header
LB: loop body
LE: loop exit
PB: predicated region body
PF: predicated region fallthrough
CT: control target
= control target key end

     0   :  { %12 = vsyncpa [#allocation3], 0  ;;  %s1696_s0 = inlined_call_operand.vmem [shape: bf16[128,128], index: 0, kind: input, shape index: {}]   ;;  %s1697_s1 = inlined_call_operand.vmem [shape: f32[16,8], index: 1, kind: input, shape index: {}]   ;;  %s1698_s2 = inlined_call_operand.vmem [shape: bf16[128,128], index: 2, kind: input, shape index: {}]   ;;  %s1699_s3 = inlined_call_operand.vmem [shape: bf16[128,128], index: 3, kind: input, shape index: {}]   ;;  %s1700_s4 = inlined_call_operand.vmem [shape: bf16[128,128], index: 4, kind: input, shape index: {}]   ;;  %s1701_s5 = inlined_call_operand.vmem [shape: bf16[128,128], index: 5, kind: input, shape index: {}]   ;;  %s1702_s6 = inlined_call_operand.vmem [shape: f32[8,128], index: 6, kind: input, shape index: {}]   ;;  %s1703_s7 = inlined_call_operand.hbm [shape: f32[16,128], index: 7, kind: output, shape index: {}]  }
   0x1   :  { %14 = vsyncpa [#allocation3 + $0x1], 0  ;;  %s1442_s24 = smov 0   ;;  %s1444_s25 = smov 0  }
   0x2   :  { %s1446_s26 = smov 0   ;;  %s1448_s27 = smov 0  }
   0x3 LB: > { %s1463_s28 = sadd.s32 4294967295, %s1397_s27   ;;  %s1082_s29 = sadd.s32 4294967294, %s1397_s27   ;;  %s1397_s27 = sphi %s1448_s27, %s1709_s27   ;;  %s1393_s26 = sphi %s1446_s26, %s1708_s26   ;;  %s1389_s25 = sphi %s1444_s25, %s1707_s25   ;;  %s1385_s24 = sphi %s1442_s24, %s1706_s24  }
   0x4   : > { %s1467_s30 = sadd.s32 1, %s1397_s27   ;;  %s184_s8 = sadd.s32 1, %s1393_s26 }
   0x5   : > { %s181_s9 = ssub.s32 %s1397_s27, %s1467_s30  ;;  %p194_p0 = scmp.ne.s32.totalorder %s1393_s26, %s1389_s25 }
   0x6   : > { %p182_p1 = scmp.eq.s32.totalorder %s181_s9, 0  ;;  %p195_p2 = scmp.eq.s32.totalorder %s1463_s28, 1 }
   0x7   : > { %p200_p3 = scmp.ne.s32.totalorder %s1389_s25, %s1385_s24  ;;  %p201_p4 = scmp.eq.s32.totalorder %s1082_s29, 1 }
   0x8   : > { %s1478_s10 = scalar_select %p182_p1, %s1393_s26, %s184_s8  }
   0x9   : > { %p1480_p5 = por %p195_p2, %p194_p0  ;;  %p1484_p6 = por %p201_p4, %p200_p3 }
   0xa   : > { %p1085_p7 = scmp.ge.s32.totalorder %s1397_s27, 1  ;;  %p250_p8 = scmp.lt.s32.totalorder %s1397_s27, 3 }
   0xc   : > { %p251_p9 = pnand %p1085_p7, %p250_p8 }
   0xd   : > { %s1087_s15 = sshll.u32 (!%p251_p9), %s1463_s28, 3  ;;  %p292_p11 = scmp.lt.s32.totalorder (!%p251_p9), %s1463_s28, 1 }
   0xe   : > { %254 = sbr.rel (%p251_p9) target bundleno = 905 (0x389), region = 48  ;;  %p287_p10 = scmp.lt.s32.totalorder (!%p251_p9), %s1087_s15, 15 }
   0xf   : > { %s1127_s22 = sshll.u32 (!%p251_p9), %s1463_s28, 7 }
  0x13   : > { %v1301_v0 = vld [vmem:[%s1698_s2 + $0x38] sm:$0xff]   ;;  %v1302_v1 = vld [vmem:[%s1698_s2 + $0x30] sm:$0xff]   ;;  %s1711_s15 = smov (!%p287_p10, %s1087_s15), 15  ;;  %v1303_v2 = vld [vmem:[%s1698_s2 + $0x28] sm:$0xff]   ;;  %v322_v20 = vlaneseq  ;;  %vm1400_vm0 = vmmov 0   ;;  %vm781_vm1 = vcmask 1041409  }
  0x14   : > { %1172 = vmatprep.subr.bf16.mxu0 %v1301_v0  ;;  %s1088_s20 = sshll.u32 %s1711_s15, 2  ;;  %v1304_v3 = vld [vmem:[%s1698_s2 + $0x20] sm:$0xff]   ;;  %v1305_v5 = vld [vmem:[%s1698_s2 + $0x18] sm:$0xff]   ;;  %v1314_v7 = vld [vmem:[%s1699_s3 + $0x30] sm:$0xff]   ;;  %vm783_vm2 = vcmask 1042434   ;;  %vm785_vm3 = vcmask 1043459  }
  0x15   : > { %1173 = vmatpush3.bf16.msra.mxu0 %v1301_v0  ;;  %s1503_s23 = scalar_lea.vmem %s1696_s0, %s1088_s20  ;;  %v1313_v6 = vld [vmem:[%s1699_s3 + $0x38] sm:$0xff]   ;;  %v1306_v8 = vld [vmem:[%s1698_s2 + $0x10] sm:$0xff]   ;;  %v1315_v9 = vld [vmem:[%s1699_s3 + $0x28] sm:$0xff]   ;;  %v1549_v21 = vshrl.u32 %v322_v20, 7  ;;  %vm787_vm4 = vcmask 1044484   ;;  %vm789_vm5 = vcmask 1045509  }
  0x16   : > { %1174 = vmatprep.subr.bf16.mxu0 %v1302_v1  ;;  %v1309_v4 = vld [vmem:[%s1503_s23] sm:$0xff]   ;;  %1196 = vmatprep.subr.bf16.mxu1 %v1313_v6  ;;  %v1307_v10 = vld [vmem:[%s1698_s2 + $0x8] sm:$0xff]   ;;  %v1317_v13 = vld [vmem:[%s1699_s3 + $0x18] sm:$0xff]   ;;  %vm791_vm6 = vcmask 1046534   ;;  %vm793_vm7 = vcmask 1047559   ;;  %s283_s20 = sand.u32 1, %s1389_s25  }
  0x17   : > { %1188 = vmatprep.mubr.bf16.mxu0 %v1309_v4  ;;  %1197 = vmatpush3.bf16.msra.mxu1 %v1313_v6  ;;  %v1316_v11 = vld [vmem:[%s1699_s3 + $0x20] sm:$0xff]   ;;  %v1310_v14 = vld [vmem:[%s1503_s23 + $0x8] sm:$0xff]   ;;  %v1311_v15 = vld [vmem:[%s1503_s23 + $0x10] sm:$0xff]   ;;  %v633_v22 = vsub.s32 2, %v1549_v21  ;;  %v324_v23 = vsub.s32 0, %v1549_v21  ;;  %v493_v24 = vsub.s32 1, %v1549_v21 }
  0x18   : > { %1198 = vmatprep.subr.bf16.mxu1 %v1314_v7  ;;  %v1308_v12 = vld [vmem:[%s1698_s2] sm:$0xff]   ;;  %v1312_v16 = vld [vmem:[%s1503_s23 + $0x18] sm:$0xff]   ;;  %v1318_v17 = vld [vmem:[%s1699_s3 + $0x10] sm:$0xff]   ;;  %s293_s23 = scalar_select %p292_p11, %s1463_s28, 1  ;;  %v640_v25 = vsub.s32 3, %v1549_v21  ;;  %v647_v31 = vsub.s32 4, %v1549_v21 }
  0x19   : > { %1175 = vmatpush3.bf16.msra.mxu0 %v1302_v1  ;;  %v1319_v18 = vld [vmem:[%s1699_s3 + $0x8] sm:$0xff]   ;;  %v1320_v19 = vld [vmem:[%s1699_s3] sm:$0xff]   ;;  %v654_v32 = vsub.s32 5, %v1549_v21  ;;  %v661_v35 = vsub.s32 6, %v1549_v21  ;;  %v668_v36 = vsub.s32 7, %v1549_v21  ;;  %v1399_v6 = vmov 0.0  }
  0x1a   : > { %1176 = vmatprep.subr.bf16.mxu0 %v1303_v2  ;;  %s1089_s29 = sshll.u32 %s293_s23, 3  ;;  %v1572_v39 = vld [vmem:[%s1702_s6] sm:$0xff]  ;;  %s1086_s21 = sshll.u32 %s283_s20, 3 }
  0x1b   : > { %1199 = vmatpush3.bf16.msra.mxu1 %v1314_v7  ;;  %s295_s13 = scalar_lea.vmem %s1697_s1, %s1089_s29  ;;  %v325_v41 = vrot.slane %v1572_v39, %v324_v23  ;;  %v1322_v7 = vld [vmem:[%s1700_s4 + $0x30] sm:$0xff]   ;;  %s285_s23 = scalar_lea.vmem [#allocation2], %s1086_s21 }
  0x1c   : > { %1200 = vmatprep.subr.bf16.mxu1 %v1315_v9  ;;  %v616_v26 = vld [vmem:[%s295_s13] sm:$0xff]  ;;  %s1011_s29 = sshll.u32 %s285_s23, 4  ;;  %s1655_s13 = scalar_lea.hbm %s1703_s7, %s1127_s22  ;;  %s1657_s29 = int_to_ptr.vmem [resolvable:$true] %s1011_s29 }
  0x1d   : > { %1177 = vmatpush3.bf16.msra.mxu0 %v1303_v2  ;;  %v620_v27 = vrot.slane %v616_v26, %v324_v23  ;;  %v634_v28 = vrot.slane %v616_v26, %v633_v22  ;;  %v627_v29 = vrot.slane %v616_v26, %v493_v24  ;;  %v641_v30 = vrot.slane %v616_v26, %v640_v25  ;;  %s998_s14 = scalar_lea.sflag [#allocation3], %s283_s20  ;;  %s1337_s28 = scalar_lea.vmem %s1657_s29, 128 }
  0x1e   : > { %1178 = vmatprep.subr.bf16.mxu0 %v1304_v3  ;;  %v648_v33 = vrot.slane %v616_v26, %v647_v31  ;;  %v655_v34 = vrot.slane %v616_v26, %v654_v32  ;;  %v662_v37 = vrot.slane %v616_v26, %v661_v35  ;;  %v669_v38 = vrot.slane %v616_v26, %v668_v36  ;;  %p1338_p12 = scmp.ne.s32.totalorder %s1657_s29, %s1337_s28  ;;  %s1401_s15 = smov [#allocation2]  }
  0x1f   : > { %1201 = vmatpush3.bf16.msra.mxu1 %v1315_v9  ;;  %622 = vbcast.lane.b32.xlu0 %v620_v27, 256  ;;  %v1324_v9 = vld [vmem:[%s1700_s4 + $0x20] sm:$0xff]   ;;  %v494_v23 = vrot.slane %v1572_v39, %v493_v24  ;;  %s1341_s16 = sshll.u32 %s1401_s15, 4  ;;  %s1342_s16 = int_to_ptr.vmem [resolvable:$false] %s1341_s16 }
  0x20   : > { %1202 = vmatprep.subr.bf16.mxu1 %v1316_v11  ;;  %636 = vbcast.lane.b32.xlu1 %v634_v28, 256  ;;  %p1339_p13 = pnand %p1338_p12, %p1480_p5  ;;  %s1343_s17 = scalar_lea.vmem %s1342_s16, 256 }
  0x21   : > { %1179 = vmatpush3.bf16.msra.mxu0 %v1304_v3  ;;  %p1344_p1 = scmp.lt.s32.totalorder %s1657_s29, %s1342_s16  ;;  %p1345_p2 = scmp.lt.s32.totalorder %s1343_s17, %s1337_s28 }
  0x22   : > { %1180 = vmatprep.subr.bf16.mxu0 %v1305_v5  ;;  %p1340_p0 = pneg %p1339_p13 }
  0x23   : > { %1203 = vmatpush3.bf16.msra.mxu1 %v1316_v11  ;;  %629 = vbcast.lane.b32.xlu0 %v627_v29, 256  ;;  %v1326_v11 = vld [vmem:[%s1700_s4 + $0x10] sm:$0xff]   ;;  %p1346_p3 = por %p1345_p2, %p1344_p1 }
  0x24   : > { %1204 = vmatprep.subr.bf16.mxu1 %v1317_v13  ;;  %643 = vbcast.lane.b32.xlu1 %v641_v30, 256 }
  0x25   : > { %1181 = vmatpush3.bf16.msra.mxu0 %v1305_v5  ;;  %v1321_v5 = vld [vmem:[%s1700_s4 + $0x38] sm:$0xff]   ;;  %p1347_p4 = pnand %p1346_p3, %p1340_p0 }
  0x26   : > { %1182 = vmatprep.subr.bf16.mxu0 %v1306_v8 }
  0x27   : > { %1205 = vmatpush3.bf16.msra.mxu1 %v1317_v13  ;;  %650 = vbcast.lane.b32.xlu0 %v648_v33, 256  ;;  %v1328_v13 = vld [vmem:[%s1700_s4] sm:$0xff]  }
  0x28   : > { %1206 = vmatprep.subr.bf16.mxu1 %v1318_v17  ;;  %657 = vbcast.lane.b32.xlu1 %v655_v34, 256 }
  0x29   : > { %1183 = vmatpush3.bf16.msra.mxu0 %v1306_v8  ;;  %v1323_v8 = vld [vmem:[%s1700_s4 + $0x28] sm:$0xff]  }
  0x2a   : > { %1184 = vmatprep.subr.bf16.mxu0 %v1307_v10 }
  0x2b   : > { %1207 = vmatpush3.bf16.msra.mxu1 %v1318_v17  ;;  %664 = vbcast.lane.b32.xlu0 %v662_v37, 256  ;;  %v1332_v17 = vld [vmem:[%s1701_s5 + $0x20] sm:$0xff]  }
  0x2c   : > { %1208 = vmatprep.subr.bf16.mxu1 %v1319_v18  ;;  %671 = vbcast.lane.b32.xlu1 %v669_v38, 256 }
  0x2d   : > { %1185 = vmatpush3.bf16.msra.mxu0 %v1307_v10  ;;  %v1325_v10 = vld [vmem:[%s1700_s4 + $0x18] sm:$0xff]  }
  0x2e   : > { %1186 = vmatprep.subr.bf16.mxu0 %v1308_v12 }
  0x2f   : > { %1209 = vmatpush3.bf16.msra.mxu1 %v1319_v18  ;;  %v1333_v18 = vld [vmem:[%s1701_s5 + $0x18] sm:$0xff]  }
  0x30   : > { %1210 = vmatprep.subr.bf16.mxu1 %v1320_v19 }
  0x31   : > { %1187 = vmatpush3.bf16.msra.mxu0 %v1308_v12  ;;  %v1327_v12 = vld [vmem:[%s1700_s4 + $0x8] sm:$0xff]  }
  0x32   : > { %1220 = vmatprep.subr.bf16.mxu0 %v1399_v6 }
  0x33   : > { %1211 = vmatpush3.bf16.msra.mxu1 %v1320_v19  ;;  %v1334_v19 = vld [vmem:[%s1701_s5 + $0x10] sm:$0xff]  }
  0x34   : > { %1189 = vmatmul.mubr.bf16.vlgmr.msra.gmra.mxu0 %v1310_v14  ;;  %1240 = vmatprep.subr.bf16.mxu1 %v1399_v6  ;;  %v1329_v14 = vld [vmem:[%s1701_s5 + $0x38] sm:$0xff]  }
  0x35   : > { %1192 = vmatprep.mubr.bf16.mxu0 %v1311_v15  ;;  %1221 = vmatpush3.bf16.msra.mxu0 %v1321_v5  ;;  %v1330_v15 = vld [vmem:[%s1701_s5 + $0x30] sm:$0xff]  }
  0x36   : > { %1222 = vmatprep.subr.bf16.mxu0 %v1399_v6 }
  0x39   : > { %1223 = vmatpush3.bf16.msra.mxu0 %v1322_v7 }
  0x3a   : > { %1224 = vmatprep.subr.bf16.mxu0 %v1399_v6 }
  0x3c   : > { %1193 = vmatmul.mubr.bf16.gmra.mxu0 %v1312_v16  ;;  %v1331_v16 = vld [vmem:[%s1701_s5 + $0x28] sm:$0xff]  }
  0x3d   : > { %1225 = vmatpush3.bf16.msra.mxu0 %v1323_v8  ;;  %1236 = vmatprep.mubr.msk.bf16.mxu0 %vm1400_vm0, %v1399_v6 }
  0x3e   : > { %1226 = vmatprep.subr.bf16.mxu0 %v1399_v6 }
  0x41   : > { %1227 = vmatpush3.bf16.msra.mxu0 %v1324_v9 }
  0x42   : > { %1228 = vmatprep.subr.bf16.mxu0 %v1399_v6 }
  0x45   : > { %1229 = vmatpush3.bf16.msra.mxu0 %v1325_v10 }
  0x46   : > { %1230 = vmatprep.subr.bf16.mxu0 %v1399_v6 }
  0x49   : > { %1231 = vmatpush3.bf16.msra.mxu0 %v1326_v11 }
  0x4a   : > { %1232 = vmatprep.subr.bf16.mxu0 %v1399_v6 }
  0x4d   : > { %1233 = vmatpush3.bf16.msra.mxu0 %v1327_v12 }
  0x4e   : > { %1234 = vmatprep.subr.bf16.mxu0 %v1399_v6 }
  0x51   : > { %1235 = vmatpush3.bf16.msra.mxu0 %v1328_v13 }
  0x91   : > { %v623_v20 = vpop.permute.xlu0 %622 }
  0x92   : > { %v637_v26 = vpop.permute.xlu1 %636 }
  0x95   : > { %v630_v27 = vpop.permute.xlu0 %629 }
  0x96   : > { %v644_v33 = vpop.permute.xlu1 %643 }
  0x99   : > { %v651_v38 = vpop.permute.xlu0 %650 }
  0xf4   : > { %v1190_v40 = vpop.f32.mrf.mxu0 }
  0xf5   : > { %v441_v46 = vadd.f32 %v1190_v40, %v325_v41 }
  0xf6   : > { %v432_v42 = vpop.f32.mrf.mxu0 }
  0xf7   : > { %v433_v44 = vadd.f32 %v432_v42, %v325_v41  ;;  %v465_v53 = vmax.f32 %v441_v46, 0.0 }
  0xf8   : > { %v1191_v43 = vpop.f32.mrf.mxu0 }
  0xf9   : > { %v444_v45 = vadd.f32 %v1191_v43, %v325_v41  ;;  %v463_v51 = vmax.f32 %v433_v44, 0.0 }
  0xfa   : > { %v435_v47 = vpop.f32.mrf.mxu0 }
  0xfb   : > { %v436_v48 = vadd.f32 %v435_v47, %v325_v41  ;;  %v466_v49 = vmax.f32 %v444_v45, 0.0 }
  0xfc   : > { %v1194_v50 = vpop.f32.mrf.mxu0 }
  0xfd   : > { %v464_v52 = vmax.f32 %v436_v48, 0.0  ;;  %v472_v56 = vpack.c.bf16 %v466_v49, %v465_v53  ;;  %v457_v60 = vadd.f32 %v1194_v50, %v325_v41  ;;  %v658_v49 = vpop.permute.xlu1 %657 }
  0xfe   : > { %v448_v54 = vpop.f32.mrf.mxu0 }
  0xff   : > { %v471_v55 = vpack.c.bf16 %v464_v52, %v463_v51  ;;  %v449_v58 = vadd.f32 %v448_v54, %v325_v41  ;;  %v469_v2 = vmax.f32 %v457_v60, 0.0 }
 0x100   : > { %v1195_v57 = vpop.f32.mrf.mxu0 }
 0x101   : > { %v460_v59 = vadd.f32 %v1195_v57, %v325_v41  ;;  %1212 = vmatprep.mubr.bf16.mxu1 %v471_v55  ;;  %v467_v0 = vmax.f32 %v449_v58, 0.0  ;;  %v672_v9 = vpop.permute.xlu1 %671 }
 0x102   : > { %v451_v61 = vpop.f32.mrf.mxu0  ;;  %1213 = vmatmul.mubr.bf16.vlgmr.msra.gmra.mxu1 %v472_v56  ;;  %v665_v56 = vpop.permute.xlu0 %664 }
 0x103   : > { %v452_v62 = vadd.f32 %v451_v61, %v325_v41  ;;  %v470_v63 = vmax.f32 %v460_v59, 0.0  ;;  %1241 = vmatpush3.bf16.msra.mxu1 %v1329_v14 }
 0x104   : > { %1242 = vmatprep.subr.bf16.mxu1 %v1399_v6 }
 0x105   : > { %v468_v1 = vmax.f32 %v452_v62, 0.0  ;;  %v474_v4 = vpack.c.bf16 %v470_v63, %v469_v2 }
 0x107   : > { %v473_v3 = vpack.c.bf16 %v468_v1, %v467_v0  ;;  %1243 = vmatpush3.bf16.msra.mxu1 %v1330_v15 }
 0x108   : > { %1244 = vmatprep.subr.bf16.mxu1 %v1399_v6 }
 0x109   : > { %1216 = vmatprep.mubr.bf16.mxu1 %v473_v3 }
 0x10a   : > { %1217 = vmatmul.mubr.bf16.gmra.mxu1 %v474_v4 }
 0x10b   : > { %1256 = vmatprep.mubr.msk.bf16.mxu1 %vm1400_vm0, %v1399_v6  ;;  %1245 = vmatpush3.bf16.msra.mxu1 %v1331_v16 }
 0x10c   : > { %1246 = vmatprep.subr.bf16.mxu1 %v1399_v6 }
 0x10f   : > { %1247 = vmatpush3.bf16.msra.mxu1 %v1332_v17 }
 0x110   : > { %1248 = vmatprep.subr.bf16.mxu1 %v1399_v6 }
 0x113   : > { %1249 = vmatpush3.bf16.msra.mxu1 %v1333_v18 }
 0x114   : > { %1250 = vmatprep.subr.bf16.mxu1 %v1399_v6 }
 0x117   : > { %1251 = vmatpush3.bf16.msra.mxu1 %v1334_v19 }
 0x118   : > { %1252 = vmatprep.subr.bf16.mxu1 %v1399_v6 }
 0x1c2   : > { %v1214_v28 = vpop.f32.mrf.mxu1 }
 0x1c3   : > { %v586_v29 = vadd.f32 %v1214_v28, %v494_v23 }
 0x1c4   : > { %v577_v30 = vpop.f32.mrf.mxu1 }
 0x1c5   : > { %v610_v31 = vmax.f32 %v586_v29, 0.0  ;;  %v578_v32 = vadd.f32 %v577_v30, %v494_v23 }
 0x1c6   : > { %v1215_v34 = vpop.f32.mrf.mxu1 }
 0x1c7   : > { %v608_v35 = vmax.f32 %v578_v32, 0.0  ;;  %v675_v36 = vmul.f32 %v637_v26, %v610_v31  ;;  %v589_v37 = vadd.f32 %v1215_v34, %v494_v23 }
 0x1c8   : > { %v580_v40 = vpop.f32.mrf.mxu1 }
 0x1c9   : > { %v673_v41 = vmul.f32 %v623_v20, %v608_v35  ;;  %v693_v42 = vrot.slane %v675_v36, 4  ;;  %v611_v43 = vmax.f32 %v589_v37, 0.0  ;;  %v581_v44 = vadd.f32 %v580_v40, %v494_v23 }
 0x1ca   : > { %v1218_v45 = vpop.f32.mrf.mxu1 }
 0x1cb   : > { %v681_v24 = vrot.slane %v673_v41, 4  ;;  %v694_v46 = vadd.f32 %v693_v42, %v675_v36  ;;  %v609_v47 = vmax.f32 %v581_v44, 0.0  ;;  %v676_v48 = vmul.f32 %v644_v33, %v611_v43 }
 0x1cc   : > { %v602_v50 = vadd.f32 %v1218_v45, %v494_v23  ;;  %v593_v51 = vpop.f32.mrf.mxu1 }
 0x1cd   : > { %v682_v52 = vadd.f32 %v681_v24, %v673_v41  ;;  %v695_v53 = vrot.slane %v694_v46, 2  ;;  %v674_v54 = vmul.f32 %v630_v27, %v609_v47  ;;  %v699_v55 = vrot.slane %v676_v48, 4 }
 0x1ce   : > { %v614_v57 = vmax.f32 %v602_v50, 0.0  ;;  %v594_v58 = vadd.f32 %v593_v51, %v494_v23  ;;  %v1219_v59 = vpop.f32.mrf.mxu1 }
 0x1cf   : > { %v683_v60 = vrot.slane %v682_v52, 2  ;;  %v696_v61 = vadd.f32 %v695_v53, %v694_v46  ;;  %v687_v62 = vrot.slane %v674_v54, 4  ;;  %v700_v63 = vadd.f32 %v699_v55, %v676_v48 }
 0x1d0   : > { %v612_v0 = vmax.f32 %v594_v58, 0.0  ;;  %v679_v1 = vmul.f32 %v665_v56, %v614_v57  ;;  %v605_v2 = vadd.f32 %v1219_v59, %v494_v23  ;;  %v596_v3 = vpop.f32.mrf.mxu1 }
 0x1d1   : > { %v684_v4 = vadd.f32 %v683_v60, %v682_v52  ;;  %v697_v5 = vrot.slane %v696_v61, 1  ;;  %v688_v7 = vadd.f32 %v687_v62, %v674_v54  ;;  %v701_v8 = vrot.slane %v700_v63, 2 }
 0x1d2   : > { %v677_v10 = vmul.f32 %v651_v38, %v612_v0  ;;  %v717_v11 = vrot.slane %v679_v1, 4  ;;  %v615_v12 = vmax.f32 %v605_v2, 0.0  ;;  %v597_v13 = vadd.f32 %v596_v3, %v494_v23 }
 0x1d3   : > { %v685_v14 = vrot.slane %v684_v4, 1  ;;  %v689_v15 = vrot.slane %v688_v7, 2  ;;  %v702_v16 = vadd.f32 %v701_v8, %v700_v63  ;;  %v698_v27 = vadd.f32 %v697_v5, %v696_v61 }
 0x1d4   : > { %v705_v17 = vrot.slane %v677_v10, 4  ;;  %v718_v18 = vadd.f32 %v717_v11, %v679_v1  ;;  %v613_v19 = vmax.f32 %v597_v13, 0.0  ;;  %v680_v20 = vmul.f32 %v672_v9, %v615_v12 }
 0x1d5   : > { %v686_v26 = vadd.f32 %v685_v14, %v684_v4  ;;  %v690_v28 = vadd.f32 %v689_v15, %v688_v7  ;;  %v703_v29 = vrot.slane %v702_v16, 1  ;;  %v731_v41 = vmul.f32 0.125, %v698_v27 }
 0x1d6   : > { %v706_v30 = vadd.f32 %v705_v17, %v677_v10  ;;  %v719_v31 = vrot.slane %v718_v18, 2  ;;  %v678_v32 = vmul.f32 %v658_v49, %v613_v19  ;;  %v723_v33 = vrot.slane %v680_v20, 4 }
 0x1d7   : > { %v729_v34 = vmul.f32 0.125, %v686_v26  ;;  %v691_v35 = vrot.slane %v690_v28, 1  ;;  %v704_v36 = vadd.f32 %v703_v29, %v702_v16  ;;  %v739_v52 = vpack.c.bf16 %v731_v41, %v731_v41  ;;  %v1336_v29 = vld [vmem:[%s1701_s5] sm:$0xff]  }
 0x1d8   : > { %v707_v37 = vrot.slane %v706_v30, 2  ;;  %v720_v23 = vadd.f32 %v719_v31, %v718_v18  ;;  %v711_v38 = vrot.slane %v678_v32, 4  ;;  %v724_v40 = vadd.f32 %v723_v33, %v680_v20 }
 0x1d9   : > { %v692_v42 = vadd.f32 %v691_v35, %v690_v28  ;;  %v737_v46 = vpack.c.bf16 %v729_v34, %v729_v34  ;;  %v732_v48 = vmul.f32 0.125, %v704_v36  ;;  %v775_v0 = vunpack.c.l.b16 %v739_v52  ;;  %v1335_v28 = vld [vmem:[%s1701_s5 + $0x8] sm:$0xff]  }
 0x1da   : > { %v708_v43 = vadd.f32 %v707_v37, %v706_v30  ;;  %v721_v44 = vrot.slane %v720_v23, 1  ;;  %v712_v45 = vadd.f32 %v711_v38, %v678_v32  ;;  %v725_v24 = vrot.slane %v724_v40, 2  ;;  %1253 = vmatpush3.bf16.msra.mxu1 %v1335_v28 }
 0x1db   : > { %v730_v47 = vmul.f32 0.125, %v692_v42  ;;  %v773_v58 = vunpack.c.l.b16 %v737_v46  ;;  %v740_v60 = vpack.c.bf16 %v732_v48, %v732_v48  ;;  %1254 = vmatprep.subr.bf16.mxu1 %v1399_v6  ;;  %v764_v30 = vrot.slane %v1572_v39, %v633_v22 }
 0x1dc   : > { %v709_v50 = vrot.slane %v708_v43, 1  ;;  %v713_v51 = vrot.slane %v712_v45, 2  ;;  %v726_v49 = vadd.f32 %v725_v24, %v724_v40  ;;  %v722_v54 = vadd.f32 %v721_v44, %v720_v23 }
 0x1dd   : > { %v738_v53 = vpack.c.bf16 %v730_v47, %v730_v47  ;;  %v776_v8 = vunpack.c.l.b16 %v740_v60  ;;  %v906_v6 = vrot.slane %v1572_v39, %v640_v25 }
 0x1de   : > { %v710_v55 = vadd.f32 %v709_v50, %v708_v43  ;;  %v714_v56 = vadd.f32 %v713_v51, %v712_v45  ;;  %v727_v57 = vrot.slane %v726_v49, 1  ;;  %v735_v2 = vmul.f32 0.125, %v722_v54  ;;  %1255 = vmatpush3.bf16.msra.mxu1 %v1336_v29 }
 0x1df   : > { %v774_v59 = vunpack.c.l.b16 %v738_v53 }
 0x1e0   : > { %v733_v61 = vmul.f32 0.125, %v710_v55  ;;  %v715_v62 = vrot.slane %v714_v56, 1  ;;  %v728_v63 = vadd.f32 %v727_v57, %v726_v49  ;;  %v743_v11 = vpack.c.bf16 %v735_v2, %v735_v2 }
 0x1e1   : > { %v782_v1 = vsel %vm781_vm1, %v774_v59, %v773_v58 }
 0x1e2   : > { %v741_v3 = vpack.c.bf16 %v733_v61, %v733_v61  ;;  %v716_v4 = vadd.f32 %v715_v62, %v714_v56  ;;  %v784_v5 = vsel %vm783_vm2, %v775_v0, %v782_v1  ;;  %v736_v7 = vmul.f32 0.125, %v728_v63 }
 0x1e3   : > { %v786_v12 = vsel %vm785_vm3, %v776_v8, %v784_v5  ;;  %v779_v17 = vunpack.c.l.b16 %v743_v11 }
 0x1e4   : > { %v734_v9 = vmul.f32 0.125, %v716_v4  ;;  %v777_v10 = vunpack.c.l.b16 %v741_v3  ;;  %v744_v14 = vpack.c.bf16 %v736_v7, %v736_v7 }
 0x1e6   : > { %v742_v13 = vpack.c.bf16 %v734_v9, %v734_v9  ;;  %v788_v16 = vsel %vm787_vm4, %v777_v10, %v786_v12  ;;  %v780_v19 = vunpack.c.l.b16 %v744_v14 }
 0x1e8   : > { %v778_v15 = vunpack.c.l.b16 %v742_v13 }
 0x1ea   : > { %v790_v18 = vsel %vm789_vm5, %v778_v15, %v788_v16 }
 0x1eb   : > { %v792_v20 = vsel %vm791_vm6, %v779_v17, %v790_v18 }
 0x1ec   : > { %v794_v26 = vsel %vm793_vm7, %v780_v19, %v792_v20 }
 0x1ed   : > { %v795_v27 = vpack.c.b16 %v794_v26, %v794_v26 }
 0x1ef   : > { %1237 = vmatmul.mubr.bf16.vlgmr.msra.gmra.mxu0 %v795_v27 }
 0x2af   : > { %v879_v31 = vpop.f32.mrf.mxu0 }
 0x2b0   : > { %v880_v32 = vadd.f32 %v879_v31, %v764_v30 }
 0x2b1   : > { %v1238_v33 = vpop.f32.mrf.mxu0 }
 0x2b2   : > { %v885_v34 = vmax.f32 %v880_v32, 0.0 }
 0x2b3   : > { %v882_v35 = vpop.f32.mrf.mxu0 }
 0x2b4   : > { %v886_v36 = vpack.c.bf16 %v885_v34, %v885_v34 }
 0x2b5   : > { %v1239_v37 = vpop.f32.mrf.mxu0 }
 0x2b6   : > { %1257 = vmatmul.mubr.bf16.vlgmr.msra.gmra.mxu1 %v886_v36 }
 0x376   : > { %v989_v23 = vpop.f32.mrf.mxu1 }
 0x377   : > { %v990_v22 = vadd.f32 %v989_v23, %v906_v6 }
 0x378   : > { %v1258_v38 = vpop.f32.mrf.mxu1 }
 0x379   : > { %v995_v40 = vmax.f32 %v990_v22, 0.0 }
 0x37a   : > { %v992_v21 = vpop.f32.mrf.mxu1 }
 0x37b   : > { %996 = vst [vmem:[%s285_s23] sm:$0xff] %v995_v40 }
 0x37c   : > { %v1259_v25 = vpop.f32.mrf.mxu1 }
 0x37d   : > { %1350 = shalt.err (!%p1347_p4)
}
 0x37e   : > { %s1351_s18 = scalar_lea.hbm %s1655_s13, 128  ;;  %s1355_s21 = scalar_lea.hbm %s1703_s7, 256 }
 0x37f   : > { %p1352_p7 = scmp.ne.s32.totalorder %s1655_s13, %s1351_s18  ;;  %p1356_p10 = scmp.lt.s32.totalorder %s1655_s13, %s1703_s7 }
 0x380   : > { %p1357_p11 = scmp.lt.s32.totalorder %s1355_s21, %s1351_s18 }
 0x381   : > { %p1353_p8 = pnand %p1352_p7, %p1480_p5 }
 0x382   : > { %p1358_p12 = por %p1357_p11, %p1356_p10 }
 0x383   : > { %p1354_p9 = pneg %p1353_p8 }
 0x385   : > { %p1359_p13 = pnand %p1358_p12, %p1354_p9 }
 0x387   : > { %1362 = shalt.err (!%p1359_p13)
}
 0x388   : > { %1260 = dma.vmem_to_hbm [thread:$0]  (%p1480_p5), %s1657_s29, 128, %s1655_s13, %s998_s14  }
 0x389 PF: > { %p1266_p0 = scmp.ge.s32.totalorder %s1397_s27, 2  ;;  %s1023_s8 = sand.u32 1, %s1385_s24  }
 0x38a   : > { %s1024_s9 = scalar_lea.sflag [#allocation3], %s1023_s8 }
 0x38b   : > { %p1263_p1 = pnand %p1266_p0, %p1484_p6 }
 0x38d   : > { %p1264_p2 = pneg %p1263_p1 }
 0x38f   : > { %1380 = dma.done.wait (%p1264_p2), %s1024_s9, 128  }
 0x390   : > { %1382 = vsyncadd (%p1264_p2), %s1024_s9, 4294967168  ;;  %p17_p3 = scmp.ge.s32.totalorder %s1467_s30, 4   ;;  %s1706_s24 = smov %s1389_s25 }
 0x391   : > { %s1707_s25 = smov %s1393_s26  ;;  %s1708_s26 = smov %s1478_s10 }
 0x392   : > { %s1709_s27 = smov %s1467_s30  ;;  %19 = sbr.rel (!%p17_p3) target bundleno = 3 (0x3), region = 86 }
 0x397   :  { %1029 = vsyncpa [#allocation3], 1 }
 0x398   :  { %1031 = vsyncpa [#allocation3 + $0x1], 1 }

</bundles_post_ra>
